<compile_context>
chip_gen: v7x
topology: tpu7x:2x2x1
jax: 0.10.0
libtpu: 0.0.40
codegen_flags: <defaults>
</compile_context>

<pallas_src>
import functools

import jax
import jax.numpy as jnp
from jax.experimental import pallas as pl
from jax.experimental.pallas import tpu as pltpu


def _round_up(n, m):
    return ((n + m - 1) // m) * m


def _num_tensorcores_per_chip():
    try:
        dk = jax.devices()[0].device_kind.lower()
        if "v7" in dk:
            return 2
    except Exception:
        pass
    return 1


def _decoder_rnn_kernel(num_layers, seq_len, hidden, *refs):
    """refs = (x_ref (T,Bb,D) f32,
               [w_ih_l (D_l,4H) bf16, w_hh_l (H,4H) f32, b_l (1,4H) f32] * L,
               fc1_w (H,Fpad) bf16, fc1_b (1,Fpad) f32,
               fc2_w (Fpad,Cpad) bf16, fc2_b (1,Cpad) f32,
               out_ref (Bb,Cpad) f32,
               seq_scratch (T,Bb,H) f32)"""
    x_ref = refs[0]
    lstm_refs = refs[1:1 + 3 * num_layers]
    fc1w_ref, fc1b_ref, fc2w_ref, fc2b_ref = refs[1 + 3 * num_layers:5 + 3 * num_layers]
    out_ref = refs[5 + 3 * num_layers]
    seq_scratch = refs[6 + 3 * num_layers]

    H = hidden
    T = seq_len
    x = x_ref[...]                                   # (T, Bb, D) f32, time-major
    Bb = x.shape[1]

    h = None
    for l in range(num_layers):
        w_ih = lstm_refs[3 * l + 0][...]             # (D_l, 4H) bf16, loaded once
        w_hh = lstm_refs[3 * l + 1][...]             # (H,  4H) f32,  loaded once
        b = lstm_refs[3 * l + 2][...]                # (1,  4H) f32  (= b_ih + b_hh)

        # Input projection for ALL timesteps at once (hoisted out of the serial
        # recurrence): single MXU matmul with M = T*Bb, reshaped time-major so
        # the time loop indexes the leading axis (free tile select).
        if l == 0:
            flat = x.reshape(T * Bb, x.shape[-1]).astype(jnp.bfloat16)
        else:
            flat = seq_scratch[...].reshape(T * Bb, H).astype(jnp.bfloat16)
        proj = jnp.dot(flat, w_ih, preferred_element_type=jnp.float32) + b
        proj = proj.reshape(T, Bb, 4 * H)            # (T, Bb, 4H) f32

        h = jnp.zeros((Bb, H), jnp.float32)
        c = jnp.zeros((Bb, H), jnp.float32)
        write_seq = l < num_layers - 1
        # T is small and static here -> unrolled.
        # TODO(synk): for large seq_len switch to lax.fori_loop(..., unroll=True)
        #             carrying (h, c) to bound live ranges / trace size.
        for t in range(T):
            # Recurrent matmul kept in f32 for accuracy (trivial cost at H=32).
            gates = proj[t] + jnp.dot(h, w_hh, preferred_element_type=jnp.float32)
            # Full 128-lane transcendentals (2 EUP pushes), then slice on the VPU.
            sig = jax.nn.sigmoid(gates)
            tg = jnp.tanh(gates)
            # PyTorch LSTM gate order: input, forget, cell(g), output.
            i_g = sig[:, 0 * H:1 * H]
            f_g = sig[:, 1 * H:2 * H]
            g_g = tg[:, 2 * H:3 * H]
            o_g = sig[:, 3 * H:4 * H]
            c = f_g * c + i_g * g_g
            h = o_g * jnp.tanh(c)
            if write_seq:
                seq_scratch[t] = h                   # writeback -> next layer's input

    last = h                                         # == RNN_out[:, -1, :]

    # fc1 + ReLU (padded to 128 lanes -> lane-dense intermediate)
    y = jnp.dot(last.astype(jnp.bfloat16), fc1w_ref[...],
                preferred_element_type=jnp.float32) + fc1b_ref[...]
    y = jnp.maximum(y, 0.0)

    # F.dropout(p, training=self.training): inference semantics => identity.
    # TODO(synk): training-mode dropout (pltpu.prng_* mask + 1/(1-p) scaling) not implemented.

    # fc2 (output padded to 128 lanes -> unmasked, lane-dense stores)
    y = jnp.dot(y.astype(jnp.bfloat16), fc2w_ref[...],
                preferred_element_type=jnp.float32) + fc2b_ref[...]
    out_ref[...] = y.astype(out_ref.dtype)


def prepare_params(params):
    """One-time weight layout prep (transpose, dtype cast, bias fold, lane
    padding). Call this ONCE at parameter-load time, not per forward call."""
    H = params["lstm"][0]["w_hh"].shape[1]
    F = params["fc1_w"].shape[0]
    C = params["fc2_w"].shape[0]
    F_pad = _round_up(F, 128)
    C_pad = _round_up(C, 128)

    lstm = []
    for p in params["lstm"]:
        w_ih_t = jnp.transpose(p["w_ih"]).astype(jnp.bfloat16)            # (D_l, 4H)
        w_hh_t = jnp.transpose(p["w_hh"]).astype(jnp.float32)             # (H, 4H), recurrent stays f32
        b = (p["b_ih"] + p["b_hh"]).reshape(1, -1).astype(jnp.float32)    # folded bias
        lstm.append((w_ih_t, w_hh_t, b))

    fc1_w = jnp.transpose(params["fc1_w"]).astype(jnp.bfloat16)           # (H, F)
    fc1_w = jnp.pad(fc1_w, ((0, 0), (0, F_pad - F)))
    fc1_b = jnp.pad(params["fc1_b"], (0, F_pad - F)).reshape(1, -1).astype(jnp.float32)
    fc2_w = jnp.transpose(params["fc2_w"]).astype(jnp.bfloat16)           # (F, C)
    fc2_w = jnp.pad(fc2_w, ((0, F_pad - F), (0, C_pad - C)))              # lane-dense in & out
    fc2_b = jnp.pad(params["fc2_b"], (0, C_pad - C)).reshape(1, -1).astype(jnp.float32)

    return {"lstm": lstm, "fc1_w": fc1_w, "fc1_b": fc1_b,
            "fc2_w": fc2_w, "fc2_b": fc2_b, "num_classes": int(C)}


def decoder_rnn_forward(x, prepped):
    """x: (B, T, CNN_out) batch_first, like the PyTorch module. Returns (B, num_classes)."""
    B, T, D = x.shape
    lstm = prepped["lstm"]
    num_layers = len(lstm)
    H = lstm[0][1].shape[0]                          # w_hh_t is (H, 4H)
    num_classes = prepped["num_classes"]
    C_pad = prepped["fc2_w"].shape[1]

    # Split the batch across the two v7x TensorCores only when the split keeps
    # sublane-aligned (multiple-of-8) blocks; otherwise a single block.
    if _num_tensorcores_per_chip() >= 2 and B % 2 == 0 and (B // 2) % 8 == 0:
        block_b = B // 2
    else:
        block_b = B
    grid = (B // block_b,)

    # One tiny per-call transpose to time-major so the kernel indexes the
    # leading (untiled) axis each timestep instead of slicing sublanes.
    x_tm = jnp.transpose(x, (1, 0, 2))               # (T, B, D)

    def _const_spec(shape):
        # Full-array block, replicated across the batch grid.
        return pl.BlockSpec(shape, lambda i, _s=shape: tuple(0 for _ in _s))

    inputs = [x_tm]
    in_specs = [pl.BlockSpec((T, block_b, D), lambda i: (0, i, 0))]
    for (w_ih_t, w_hh_t, b) in lstm:
        inputs += [w_ih_t, w_hh_t, b]
        in_specs += [_const_spec(w_ih_t.shape), _const_spec(w_hh_t.shape),
                     _const_spec(b.shape)]
    inputs += [prepped["fc1_w"], prepped["fc1_b"], prepped["fc2_w"], prepped["fc2_b"]]
    in_specs += [_const_spec(prepped["fc1_w"].shape), _const_spec(prepped["fc1_b"].shape),
                 _const_spec(prepped["fc2_w"].shape), _const_spec(prepped["fc2_b"].shape)]

    kernel = functools.partial(_decoder_rnn_kernel, num_layers, T, H)

    out_padded = pl.pallas_call(
        kernel,
        out_shape=jax.ShapeDtypeStruct((B, C_pad), jnp.float32),
        grid=grid,
        in_specs=in_specs,
        out_specs=pl.BlockSpec((block_b, C_pad), lambda i: (i, 0)),
        scratch_shapes=[pltpu.VMEM((T, block_b, H), jnp.float32)],
        compiler_params=pltpu.CompilerParams(dimension_semantics=("parallel",)),
    )(*inputs)
    return out_padded[:, :num_classes]


def init_params(key, CNN_out, h_RNN_layers, h_RNN, h_FC_dim, num_classes):
    """Deterministic synthetic parameters, PyTorch-style shapes / uniform(-k, k)."""
    k = 1.0 / jnp.sqrt(h_RNN)
    params = {"lstm": []}
    for l in range(h_RNN_layers):
        in_dim = CNN_out if l == 0 else h_RNN
        key, k1, k2, k3, k4 = jax.random.split(key, 5)
        params["lstm"].append({
            "w_ih": jax.random.uniform(k1, (4 * h_RNN, in_dim), jnp.float32, -k, k),
            "w_hh": jax.random.uniform(k2, (4 * h_RNN, h_RNN), jnp.float32, -k, k),
            "b_ih": jax.random.uniform(k3, (4 * h_RNN,), jnp.float32, -k, k),
            "b_hh": jax.random.uniform(k4, (4 * h_RNN,), jnp.float32, -k, k),
        })
    key, k1, k2, k3, k4 = jax.random.split(key, 5)
    kf1 = 1.0 / jnp.sqrt(h_RNN)
    kf2 = 1.0 / jnp.sqrt(h_FC_dim)
    params["fc1_w"] = jax.random.uniform(k1, (h_FC_dim, h_RNN), jnp.float32, -kf1, kf1)
    params["fc1_b"] = jax.random.uniform(k2, (h_FC_dim,), jnp.float32, -kf1, kf1)
    params["fc2_w"] = jax.random.uniform(k3, (num_classes, h_FC_dim), jnp.float32, -kf2, kf2)
    params["fc2_b"] = jax.random.uniform(k4, (num_classes,), jnp.float32, -kf2, kf2)
    return params


def decoder_rnn_reference(x, params):
    """Pure-JAX f32 reference of the same forward pass (sanity check)."""
    B, T, _ = x.shape
    num_layers = len(params["lstm"])
    H = params["lstm"][0]["w_hh"].shape[1]
    h = [jnp.zeros((B, H), jnp.float32) for _ in range(num_layers)]
    c = [jnp.zeros((B, H), jnp.float32) for _ in range(num_layers)]
    for t in range(T):
        layer_in = x[:, t, :]
        for l in range(num_layers):
            p = params["lstm"][l]
            gates = layer_in @ p["w_ih"].T + h[l] @ p["w_hh"].T + p["b_ih"] + p["b_hh"]
            i_g = jax.nn.sigmoid(gates[:, 0 * H:1 * H])
            f_g = jax.nn.sigmoid(gates[:, 1 * H:2 * H])
            g_g = jnp.tanh(gates[:, 2 * H:3 * H])
            o_g = jax.nn.sigmoid(gates[:, 3 * H:4 * H])
            c[l] = f_g * c[l] + i_g * g_g
            h[l] = o_g * jnp.tanh(c[l])
            layer_in = h[l]
    y = jnp.maximum(h[-1] @ params["fc1_w"].T + params["fc1_b"], 0.0)
    return y @ params["fc2_w"].T + params["fc2_b"]


if __name__ == "__main__":
    # Module hyperparameters (small, consistent with DecoderRNN.__init__)
    CNN_out, h_RNN_layers, h_RNN, h_FC_dim, dropout, num_classes = 32, 2, 32, 16, 0.3, 10
    batch, seq = 2, 8

    key = jax.random.PRNGKey(0)
    key, xk, pk = jax.random.split(key, 3)
    x = jax.random.normal(xk, (batch, seq, CNN_out), jnp.float32)   # (B, T, CNN_out)
    params = init_params(pk, CNN_out, h_RNN_layers, h_RNN, h_FC_dim, num_classes)

    prepped = prepare_params(params)     # one-time weight layout prep (not per call)

    out = decoder_rnn_forward(x, prepped)
    out = jax.block_until_ready(out)

    ref = decoder_rnn_reference(x, params)
    assert out.shape == (batch, num_classes)
    # Only the batched input projections and fc matmuls use bf16 inputs
    # (f32 accumulation); the recurrence is f32, so error is small. Keep a
    # conservative tolerance.
    assert jnp.allclose(out, ref, rtol=5e-2, atol=5e-2)

    print("KERNEL_OK")
</pallas_src>

<mosaic_0001>
module attributes {stable_mosaic.version = 11 : i64} {
  func.func @_decoder_rnn_kernel(%arg0: i32, %arg1: memref<8x2x32xf32, #tpu.memory_space<vmem>>, %arg2: memref<32x128xbf16, #tpu.memory_space<vmem>>, %arg3: memref<32x128xf32, #tpu.memory_space<vmem>>, %arg4: memref<1x128xf32, #tpu.memory_space<vmem>>, %arg5: memref<32x128xbf16, #tpu.memory_space<vmem>>, %arg6: memref<32x128xf32, #tpu.memory_space<vmem>>, %arg7: memref<1x128xf32, #tpu.memory_space<vmem>>, %arg8: memref<32x128xbf16, #tpu.memory_space<vmem>>, %arg9: memref<1x128xf32, #tpu.memory_space<vmem>>, %arg10: memref<128x128xbf16, #tpu.memory_space<vmem>>, %arg11: memref<1x128xf32, #tpu.memory_space<vmem>>, %arg12: memref<2x128xf32, #tpu.memory_space<vmem>>, %arg13: memref<8x2x32xf32, #tpu.memory_space<vmem>>) attributes {dimension_semantics = [#tpu.dimension_semantics<parallel>], iteration_bounds = array<i64: 1>, scalar_prefetch = 0 : i64, scratch_operands = 1 : i64, tpu.core_type = #tpu.core_type<tc>, window_params = [{transform_indices = @transform_0, window_bounds = array<i64: 8, 2, 32>}, {pipeline_mode = #tpu.pipeline_mode<synchronous>, transform_indices = @transform_1, window_bounds = array<i64: 32, 128>}, {pipeline_mode = #tpu.pipeline_mode<synchronous>, transform_indices = @transform_2, window_bounds = array<i64: 32, 128>}, {pipeline_mode = #tpu.pipeline_mode<synchronous>, transform_indices = @transform_3, window_bounds = array<i64: 1, 128>}, {pipeline_mode = #tpu.pipeline_mode<synchronous>, transform_indices = @transform_4, window_bounds = array<i64: 32, 128>}, {pipeline_mode = #tpu.pipeline_mode<synchronous>, transform_indices = @transform_5, window_bounds = array<i64: 32, 128>}, {pipeline_mode = #tpu.pipeline_mode<synchronous>, transform_indices = @transform_6, window_bounds = array<i64: 1, 128>}, {pipeline_mode = #tpu.pipeline_mode<synchronous>, transform_indices = @transform_7, window_bounds = array<i64: 32, 128>}, {pipeline_mode = #tpu.pipeline_mode<synchronous>, transform_indices = @transform_8, window_bounds = array<i64: 1, 128>}, {pipeline_mode = #tpu.pipeline_mode<synchronous>, transform_indices = @transform_9, window_bounds = array<i64: 128, 128>}, {pipeline_mode = #tpu.pipeline_mode<synchronous>, transform_indices = @transform_10, window_bounds = array<i64: 1, 128>}, {transform_indices = @transform_11, window_bounds = array<i64: 2, 128>}]} {
    %c0 = arith.constant 0 : index
    %c0_0 = arith.constant 0 : index
    %c0_1 = arith.constant 0 : index
    %0 = vector.load %arg1[%c0, %c0_0, %c0_1] : memref<8x2x32xf32, #tpu.memory_space<vmem>>, vector<8x2x32xf32>
    %c0_2 = arith.constant 0 : index
    %c0_3 = arith.constant 0 : index
    %1 = vector.load %arg2[%c0_2, %c0_3] : memref<32x128xbf16, #tpu.memory_space<vmem>>, vector<32x128xbf16>
    %c0_4 = arith.constant 0 : index
    %c0_5 = arith.constant 0 : index
    %2 = vector.load %arg3[%c0_4, %c0_5] : memref<32x128xf32, #tpu.memory_space<vmem>>, vector<32x128xf32>
    %c0_6 = arith.constant 0 : index
    %c0_7 = arith.constant 0 : index
    %3 = vector.load %arg4[%c0_6, %c0_7] : memref<1x128xf32, #tpu.memory_space<vmem>>, vector<1x128xf32>
    %4 = vector.shape_cast %0 : vector<8x2x32xf32> to vector<16x32xf32>
    %5 = arith.truncf %4 : vector<16x32xf32> to vector<16x32xbf16>
    %cst = arith.constant dense<0.000000e+00> : vector<16x128xf32>
    %6 = tpu.matmul %5, %1, %cst {dimension_numbers = #tpu.dot_dimension_numbers<[1], [0], [0], [1], [0, 0, 1, 1], [], []>} : vector<16x32xbf16>, vector<32x128xbf16>, vector<16x128xf32> -> vector<16x128xf32>
    %7 = vector.broadcast %3 : vector<1x128xf32> to vector<16x128xf32>
    %8 = arith.addf %6, %7 : vector<16x128xf32>
    %9 = vector.shape_cast %8 : vector<16x128xf32> to vector<8x2x128xf32>
    %cst_8 = arith.constant 0.000000e+00 : f32
    %10 = vector.broadcast %cst_8 : f32 to vector<2x32xf32>
    %cst_9 = arith.constant 0.000000e+00 : f32
    %11 = vector.broadcast %cst_9 : f32 to vector<2x32xf32>
    %12 = vector.extract_strided_slice %9 {offsets = [0, 0, 0], sizes = [1, 2, 128], strides = [1, 1, 1]} : vector<8x2x128xf32> to vector<1x2x128xf32>
    %13 = vector.shape_cast %12 : vector<1x2x128xf32> to vector<2x128xf32>
    %cst_10 = arith.constant dense<0.000000e+00> : vector<2x128xf32>
    %14 = tpu.matmul %10, %2, %cst_10 {dimension_numbers = #tpu.dot_dimension_numbers<[1], [0], [0], [1], [0, 0, 1, 1], [], []>} : vector<2x32xf32>, vector<32x128xf32>, vector<2x128xf32> -> vector<2x128xf32>
    %15 = arith.addf %13, %14 : vector<2x128xf32>
    %16 = arith.negf %15 : vector<2x128xf32>
    %17 = math.exp %16 : vector<2x128xf32>
    %cst_11 = arith.constant 1.000000e+00 : f32
    %18 = vector.broadcast %cst_11 : f32 to vector<2x128xf32>
    %19 = arith.addf %18, %17 : vector<2x128xf32>
    %20 = arith.divf %18, %19 : vector<2x128xf32>
    %21 = math.tanh %15 : vector<2x128xf32>
    %22 = vector.extract_strided_slice %20 {offsets = [0, 0], sizes = [2, 32], strides = [1, 1]} : vector<2x128xf32> to vector<2x32xf32>
    %23 = vector.extract_strided_slice %20 {offsets = [0, 32], sizes = [2, 32], strides = [1, 1]} : vector<2x128xf32> to vector<2x32xf32>
    %24 = vector.extract_strided_slice %21 {offsets = [0, 64], sizes = [2, 32], strides = [1, 1]} : vector<2x128xf32> to vector<2x32xf32>
    %25 = vector.extract_strided_slice %20 {offsets = [0, 96], sizes = [2, 32], strides = [1, 1]} : vector<2x128xf32> to vector<2x32xf32>
    %26 = arith.mulf %23, %11 : vector<2x32xf32>
    %27 = arith.mulf %22, %24 : vector<2x32xf32>
    %28 = arith.addf %26, %27 : vector<2x32xf32>
    %29 = math.tanh %28 : vector<2x32xf32>
    %30 = arith.mulf %25, %29 : vector<2x32xf32>
    %c0_12 = arith.constant 0 : index
    %c0_13 = arith.constant 0 : index
    %c0_14 = arith.constant 0 : index
    %31 = vector.load %arg13[%c0_12, %c0_13, %c0_14] : memref<8x2x32xf32, #tpu.memory_space<vmem>>, vector<1x2x32xf32>
    %32 = vector.shape_cast %31 : vector<1x2x32xf32> to vector<2x32xf32>
    %33 = vector.shape_cast %30 : vector<2x32xf32> to vector<1x2x32xf32>
    tpu.vector_store %arg13[%c0_12, %c0_13, %c0_14], %33 {strides = array<i32>} : memref<8x2x32xf32, #tpu.memory_space<vmem>>, vector<1x2x32xf32>,
    %34 = vector.extract_strided_slice %9 {offsets = [1, 0, 0], sizes = [1, 2, 128], strides = [1, 1, 1]} : vector<8x2x128xf32> to vector<1x2x128xf32>
    %35 = vector.shape_cast %34 : vector<1x2x128xf32> to vector<2x128xf32>
    %cst_15 = arith.constant dense<0.000000e+00> : vector<2x128xf32>
    %36 = tpu.matmul %30, %2, %cst_15 {dimension_numbers = #tpu.dot_dimension_numbers<[1], [0], [0], [1], [0, 0, 1, 1], [], []>} : vector<2x32xf32>, vector<32x128xf32>, vector<2x128xf32> -> vector<2x128xf32>
    %37 = arith.addf %35, %36 : vector<2x128xf32>
    %38 = arith.negf %37 : vector<2x128xf32>
    %39 = math.exp %38 : vector<2x128xf32>
    %cst_16 = arith.constant 1.000000e+00 : f32
    %40 = vector.broadcast %cst_16 : f32 to vector<2x128xf32>
    %41 = arith.addf %40, %39 : vector<2x128xf32>
    %42 = arith.divf %40, %41 : vector<2x128xf32>
    %43 = math.tanh %37 : vector<2x128xf32>
    %44 = vector.extract_strided_slice %42 {offsets = [0, 0], sizes = [2, 32], strides = [1, 1]} : vector<2x128xf32> to vector<2x32xf32>
    %45 = vector.extract_strided_slice %42 {offsets = [0, 32], sizes = [2, 32], strides = [1, 1]} : vector<2x128xf32> to vector<2x32xf32>
    %46 = vector.extract_strided_slice %43 {offsets = [0, 64], sizes = [2, 32], strides = [1, 1]} : vector<2x128xf32> to vector<2x32xf32>
    %47 = vector.extract_strided_slice %42 {offsets = [0, 96], sizes = [2, 32], strides = [1, 1]} : vector<2x128xf32> to vector<2x32xf32>
    %48 = arith.mulf %45, %28 : vector<2x32xf32>
    %49 = arith.mulf %44, %46 : vector<2x32xf32>
    %50 = arith.addf %48, %49 : vector<2x32xf32>
    %51 = math.tanh %50 : vector<2x32xf32>
    %52 = arith.mulf %47, %51 : vector<2x32xf32>
    %c1 = arith.constant 1 : index
    %c0_17 = arith.constant 0 : index
    %c0_18 = arith.constant 0 : index
    %53 = vector.load %arg13[%c1, %c0_17, %c0_18] : memref<8x2x32xf32, #tpu.memory_space<vmem>>, vector<1x2x32xf32>
    %54 = vector.shape_cast %53 : vector<1x2x32xf32> to vector<2x32xf32>
    %55 = vector.shape_cast %52 : vector<2x32xf32> to vector<1x2x32xf32>
    tpu.vector_store %arg13[%c1, %c0_17, %c0_18], %55 {strides = array<i32>} : memref<8x2x32xf32, #tpu.memory_space<vmem>>, vector<1x2x32xf32>,
    %56 = vector.extract_strided_slice %9 {offsets = [2, 0, 0], sizes = [1, 2, 128], strides = [1, 1, 1]} : vector<8x2x128xf32> to vector<1x2x128xf32>
    %57 = vector.shape_cast %56 : vector<1x2x128xf32> to vector<2x128xf32>
    %cst_19 = arith.constant dense<0.000000e+00> : vector<2x128xf32>
    %58 = tpu.matmul %52, %2, %cst_19 {dimension_numbers = #tpu.dot_dimension_numbers<[1], [0], [0], [1], [0, 0, 1, 1], [], []>} : vector<2x32xf32>, vector<32x128xf32>, vector<2x128xf32> -> vector<2x128xf32>
    %59 = arith.addf %57, %58 : vector<2x128xf32>
    %60 = arith.negf %59 : vector<2x128xf32>
    %61 = math.exp %60 : vector<2x128xf32>
    %cst_20 = arith.constant 1.000000e+00 : f32
    %62 = vector.broadcast %cst_20 : f32 to vector<2x128xf32>
    %63 = arith.addf %62, %61 : vector<2x128xf32>
    %64 = arith.divf %62, %63 : vector<2x128xf32>
    %65 = math.tanh %59 : vector<2x128xf32>
    %66 = vector.extract_strided_slice %64 {offsets = [0, 0], sizes = [2, 32], strides = [1, 1]} : vector<2x128xf32> to vector<2x32xf32>
    %67 = vector.extract_strided_slice %64 {offsets = [0, 32], sizes = [2, 32], strides = [1, 1]} : vector<2x128xf32> to vector<2x32xf32>
    %68 = vector.extract_strided_slice %65 {offsets = [0, 64], sizes = [2, 32], strides = [1, 1]} : vector<2x128xf32> to vector<2x32xf32>
    %69 = vector.extract_strided_slice %64 {offsets = [0, 96], sizes = [2, 32], strides = [1, 1]} : vector<2x128xf32> to vector<2x32xf32>
    %70 = arith.mulf %67, %50 : vector<2x32xf32>
    %71 = arith.mulf %66, %68 : vector<2x32xf32>
    %72 = arith.addf %70, %71 : vector<2x32xf32>
    %73 = math.tanh %72 : vector<2x32xf32>
    %74 = arith.mulf %69, %73 : vector<2x32xf32>
    %c2 = arith.constant 2 : index
    %c0_21 = arith.constant 0 : index
    %c0_22 = arith.constant 0 : index
    %75 = vector.load %arg13[%c2, %c0_21, %c0_22] : memref<8x2x32xf32, #tpu.memory_space<vmem>>, vector<1x2x32xf32>
    %76 = vector.shape_cast %75 : vector<1x2x32xf32> to vector<2x32xf32>
    %77 = vector.shape_cast %74 : vector<2x32xf32> to vector<1x2x32xf32>
    tpu.vector_store %arg13[%c2, %c0_21, %c0_22], %77 {strides = array<i32>} : memref<8x2x32xf32, #tpu.memory_space<vmem>>, vector<1x2x32xf32>,
    %78 = vector.extract_strided_slice %9 {offsets = [3, 0, 0], sizes = [1, 2, 128], strides = [1, 1, 1]} : vector<8x2x128xf32> to vector<1x2x128xf32>
    %79 = vector.shape_cast %78 : vector<1x2x128xf32> to vector<2x128xf32>
    %cst_23 = arith.constant dense<0.000000e+00> : vector<2x128xf32>
    %80 = tpu.matmul %74, %2, %cst_23 {dimension_numbers = #tpu.dot_dimension_numbers<[1], [0], [0], [1], [0, 0, 1, 1], [], []>} : vector<2x32xf32>, vector<32x128xf32>, vector<2x128xf32> -> vector<2x128xf32>
    %81 = arith.addf %79, %80 : vector<2x128xf32>
    %82 = arith.negf %81 : vector<2x128xf32>
    %83 = math.exp %82 : vector<2x128xf32>
    %cst_24 = arith.constant 1.000000e+00 : f32
    %84 = vector.broadcast %cst_24 : f32 to vector<2x128xf32>
    %85 = arith.addf %84, %83 : vector<2x128xf32>
    %86 = arith.divf %84, %85 : vector<2x128xf32>
    %87 = math.tanh %81 : vector<2x128xf32>
    %88 = vector.extract_strided_slice %86 {offsets = [0, 0], sizes = [2, 32], strides = [1, 1]} : vector<2x128xf32> to vector<2x32xf32>
    %89 = vector.extract_strided_slice %86 {offsets = [0, 32], sizes = [2, 32], strides = [1, 1]} : vector<2x128xf32> to vector<2x32xf32>
    %90 = vector.extract_strided_slice %87 {offsets = [0, 64], sizes = [2, 32], strides = [1, 1]} : vector<2x128xf32> to vector<2x32xf32>
    %91 = vector.extract_strided_slice %86 {offsets = [0, 96], sizes = [2, 32], strides = [1, 1]} : vector<2x128xf32> to vector<2x32xf32>
    %92 = arith.mulf %89, %72 : vector<2x32xf32>
    %93 = arith.mulf %88, %90 : vector<2x32xf32>
    %94 = arith.addf %92, %93 : vector<2x32xf32>
    %95 = math.tanh %94 : vector<2x32xf32>
    %96 = arith.mulf %91, %95 : vector<2x32xf32>
    %c3 = arith.constant 3 : index
    %c0_25 = arith.constant 0 : index
    %c0_26 = arith.constant 0 : index
    %97 = vector.load %arg13[%c3, %c0_25, %c0_26] : memref<8x2x32xf32, #tpu.memory_space<vmem>>, vector<1x2x32xf32>
    %98 = vector.shape_cast %97 : vector<1x2x32xf32> to vector<2x32xf32>
    %99 = vector.shape_cast %96 : vector<2x32xf32> to vector<1x2x32xf32>
    tpu.vector_store %arg13[%c3, %c0_25, %c0_26], %99 {strides = array<i32>} : memref<8x2x32xf32, #tpu.memory_space<vmem>>, vector<1x2x32xf32>,
    %100 = vector.extract_strided_slice %9 {offsets = [4, 0, 0], sizes = [1, 2, 128], strides = [1, 1, 1]} : vector<8x2x128xf32> to vector<1x2x128xf32>
    %101 = vector.shape_cast %100 : vector<1x2x128xf32> to vector<2x128xf32>
    %cst_27 = arith.constant dense<0.000000e+00> : vector<2x128xf32>
    %102 = tpu.matmul %96, %2, %cst_27 {dimension_numbers = #tpu.dot_dimension_numbers<[1], [0], [0], [1], [0, 0, 1, 1], [], []>} : vector<2x32xf32>, vector<32x128xf32>, vector<2x128xf32> -> vector<2x128xf32>
    %103 = arith.addf %101, %102 : vector<2x128xf32>
    %104 = arith.negf %103 : vector<2x128xf32>
    %105 = math.exp %104 : vector<2x128xf32>
    %cst_28 = arith.constant 1.000000e+00 : f32
    %106 = vector.broadcast %cst_28 : f32 to vector<2x128xf32>
    %107 = arith.addf %106, %105 : vector<2x128xf32>
    %108 = arith.divf %106, %107 : vector<2x128xf32>
    %109 = math.tanh %103 : vector<2x128xf32>
    %110 = vector.extract_strided_slice %108 {offsets = [0, 0], sizes = [2, 32], strides = [1, 1]} : vector<2x128xf32> to vector<2x32xf32>
    %111 = vector.extract_strided_slice %108 {offsets = [0, 32], sizes = [2, 32], strides = [1, 1]} : vector<2x128xf32> to vector<2x32xf32>
    %112 = vector.extract_strided_slice %109 {offsets = [0, 64], sizes = [2, 32], strides = [1, 1]} : vector<2x128xf32> to vector<2x32xf32>
    %113 = vector.extract_strided_slice %108 {offsets = [0, 96], sizes = [2, 32], strides = [1, 1]} : vector<2x128xf32> to vector<2x32xf32>
    %114 = arith.mulf %111, %94 : vector<2x32xf32>
    %115 = arith.mulf %110, %112 : vector<2x32xf32>
    %116 = arith.addf %114, %115 : vector<2x32xf32>
    %117 = math.tanh %116 : vector<2x32xf32>
    %118 = arith.mulf %113, %117 : vector<2x32xf32>
    %c4 = arith.constant 4 : index
    %c0_29 = arith.constant 0 : index
    %c0_30 = arith.constant 0 : index
    %119 = vector.load %arg13[%c4, %c0_29, %c0_30] : memref<8x2x32xf32, #tpu.memory_space<vmem>>, vector<1x2x32xf32>
    %120 = vector.shape_cast %119 : vector<1x2x32xf32> to vector<2x32xf32>
    %121 = vector.shape_cast %118 : vector<2x32xf32> to vector<1x2x32xf32>
    tpu.vector_store %arg13[%c4, %c0_29, %c0_30], %121 {strides = array<i32>} : memref<8x2x32xf32, #tpu.memory_space<vmem>>, vector<1x2x32xf32>,
    %122 = vector.extract_strided_slice %9 {offsets = [5, 0, 0], sizes = [1, 2, 128], strides = [1, 1, 1]} : vector<8x2x128xf32> to vector<1x2x128xf32>
    %123 = vector.shape_cast %122 : vector<1x2x128xf32> to vector<2x128xf32>
    %cst_31 = arith.constant dense<0.000000e+00> : vector<2x128xf32>
    %124 = tpu.matmul %118, %2, %cst_31 {dimension_numbers = #tpu.dot_dimension_numbers<[1], [0], [0], [1], [0, 0, 1, 1], [], []>} : vector<2x32xf32>, vector<32x128xf32>, vector<2x128xf32> -> vector<2x128xf32>
    %125 = arith.addf %123, %124 : vector<2x128xf32>
    %126 = arith.negf %125 : vector<2x128xf32>
    %127 = math.exp %126 : vector<2x128xf32>
    %cst_32 = arith.constant 1.000000e+00 : f32
    %128 = vector.broadcast %cst_32 : f32 to vector<2x128xf32>
    %129 = arith.addf %128, %127 : vector<2x128xf32>
    %130 = arith.divf %128, %129 : vector<2x128xf32>
    %131 = math.tanh %125 : vector<2x128xf32>
    %132 = vector.extract_strided_slice %130 {offsets = [0, 0], sizes = [2, 32], strides = [1, 1]} : vector<2x128xf32> to vector<2x32xf32>
    %133 = vector.extract_strided_slice %130 {offsets = [0, 32], sizes = [2, 32], strides = [1, 1]} : vector<2x128xf32> to vector<2x32xf32>
    %134 = vector.extract_strided_slice %131 {offsets = [0, 64], sizes = [2, 32], strides = [1, 1]} : vector<2x128xf32> to vector<2x32xf32>
    %135 = vector.extract_strided_slice %130 {offsets = [0, 96], sizes = [2, 32], strides = [1, 1]} : vector<2x128xf32> to vector<2x32xf32>
    %136 = arith.mulf %133, %116 : vector<2x32xf32>
    %137 = arith.mulf %132, %134 : vector<2x32xf32>
    %138 = arith.addf %136, %137 : vector<2x32xf32>
    %139 = math.tanh %138 : vector<2x32xf32>
    %140 = arith.mulf %135, %139 : vector<2x32xf32>
    %c5 = arith.constant 5 : index
    %c0_33 = arith.constant 0 : index
    %c0_34 = arith.constant 0 : index
    %141 = vector.load %arg13[%c5, %c0_33, %c0_34] : memref<8x2x32xf32, #tpu.memory_space<vmem>>, vector<1x2x32xf32>
    %142 = vector.shape_cast %141 : vector<1x2x32xf32> to vector<2x32xf32>
    %143 = vector.shape_cast %140 : vector<2x32xf32> to vector<1x2x32xf32>
    tpu.vector_store %arg13[%c5, %c0_33, %c0_34], %143 {strides = array<i32>} : memref<8x2x32xf32, #tpu.memory_space<vmem>>, vector<1x2x32xf32>,
    %144 = vector.extract_strided_slice %9 {offsets = [6, 0, 0], sizes = [1, 2, 128], strides = [1, 1, 1]} : vector<8x2x128xf32> to vector<1x2x128xf32>
    %145 = vector.shape_cast %144 : vector<1x2x128xf32> to vector<2x128xf32>
    %cst_35 = arith.constant dense<0.000000e+00> : vector<2x128xf32>
    %146 = tpu.matmul %140, %2, %cst_35 {dimension_numbers = #tpu.dot_dimension_numbers<[1], [0], [0], [1], [0, 0, 1, 1], [], []>} : vector<2x32xf32>, vector<32x128xf32>, vector<2x128xf32> -> vector<2x128xf32>
    %147 = arith.addf %145, %146 : vector<2x128xf32>
    %148 = arith.negf %147 : vector<2x128xf32>
    %149 = math.exp %148 : vector<2x128xf32>
    %cst_36 = arith.constant 1.000000e+00 : f32
    %150 = vector.broadcast %cst_36 : f32 to vector<2x128xf32>
    %151 = arith.addf %150, %149 : vector<2x128xf32>
    %152 = arith.divf %150, %151 : vector<2x128xf32>
    %153 = math.tanh %147 : vector<2x128xf32>
    %154 = vector.extract_strided_slice %152 {offsets = [0, 0], sizes = [2, 32], strides = [1, 1]} : vector<2x128xf32> to vector<2x32xf32>
    %155 = vector.extract_strided_slice %152 {offsets = [0, 32], sizes = [2, 32], strides = [1, 1]} : vector<2x128xf32> to vector<2x32xf32>
    %156 = vector.extract_strided_slice %153 {offsets = [0, 64], sizes = [2, 32], strides = [1, 1]} : vector<2x128xf32> to vector<2x32xf32>
    %157 = vector.extract_strided_slice %152 {offsets = [0, 96], sizes = [2, 32], strides = [1, 1]} : vector<2x128xf32> to vector<2x32xf32>
    %158 = arith.mulf %155, %138 : vector<2x32xf32>
    %159 = arith.mulf %154, %156 : vector<2x32xf32>
    %160 = arith.addf %158, %159 : vector<2x32xf32>
    %161 = math.tanh %160 : vector<2x32xf32>
    %162 = arith.mulf %157, %161 : vector<2x32xf32>
    %c6 = arith.constant 6 : index
    %c0_37 = arith.constant 0 : index
    %c0_38 = arith.constant 0 : index
    %163 = vector.load %arg13[%c6, %c0_37, %c0_38] : memref<8x2x32xf32, #tpu.memory_space<vmem>>, vector<1x2x32xf32>
    %164 = vector.shape_cast %163 : vector<1x2x32xf32> to vector<2x32xf32>
    %165 = vector.shape_cast %162 : vector<2x32xf32> to vector<1x2x32xf32>
    tpu.vector_store %arg13[%c6, %c0_37, %c0_38], %165 {strides = array<i32>} : memref<8x2x32xf32, #tpu.memory_space<vmem>>, vector<1x2x32xf32>,
    %166 = vector.extract_strided_slice %9 {offsets = [7, 0, 0], sizes = [1, 2, 128], strides = [1, 1, 1]} : vector<8x2x128xf32> to vector<1x2x128xf32>
    %167 = vector.shape_cast %166 : vector<1x2x128xf32> to vector<2x128xf32>
    %cst_39 = arith.constant dense<0.000000e+00> : vector<2x128xf32>
    %168 = tpu.matmul %162, %2, %cst_39 {dimension_numbers = #tpu.dot_dimension_numbers<[1], [0], [0], [1], [0, 0, 1, 1], [], []>} : vector<2x32xf32>, vector<32x128xf32>, vector<2x128xf32> -> vector<2x128xf32>
    %169 = arith.addf %167, %168 : vector<2x128xf32>
    %170 = arith.negf %169 : vector<2x128xf32>
    %171 = math.exp %170 : vector<2x128xf32>
    %cst_40 = arith.constant 1.000000e+00 : f32
    %172 = vector.broadcast %cst_40 : f32 to vector<2x128xf32>
    %173 = arith.addf %172, %171 : vector<2x128xf32>
    %174 = arith.divf %172, %173 : vector<2x128xf32>
    %175 = math.tanh %169 : vector<2x128xf32>
    %176 = vector.extract_strided_slice %174 {offsets = [0, 0], sizes = [2, 32], strides = [1, 1]} : vector<2x128xf32> to vector<2x32xf32>
    %177 = vector.extract_strided_slice %174 {offsets = [0, 32], sizes = [2, 32], strides = [1, 1]} : vector<2x128xf32> to vector<2x32xf32>
    %178 = vector.extract_strided_slice %175 {offsets = [0, 64], sizes = [2, 32], strides = [1, 1]} : vector<2x128xf32> to vector<2x32xf32>
    %179 = vector.extract_strided_slice %174 {offsets = [0, 96], sizes = [2, 32], strides = [1, 1]} : vector<2x128xf32> to vector<2x32xf32>
    %180 = arith.mulf %177, %160 : vector<2x32xf32>
    %181 = arith.mulf %176, %178 : vector<2x32xf32>
    %182 = arith.addf %180, %181 : vector<2x32xf32>
    %183 = math.tanh %182 : vector<2x32xf32>
    %184 = arith.mulf %179, %183 : vector<2x32xf32>
    %c7 = arith.constant 7 : index
    %c0_41 = arith.constant 0 : index
    %c0_42 = arith.constant 0 : index
    %185 = vector.load %arg13[%c7, %c0_41, %c0_42] : memref<8x2x32xf32, #tpu.memory_space<vmem>>, vector<1x2x32xf32>
    %186 = vector.shape_cast %185 : vector<1x2x32xf32> to vector<2x32xf32>
    %187 = vector.shape_cast %184 : vector<2x32xf32> to vector<1x2x32xf32>
    tpu.vector_store %arg13[%c7, %c0_41, %c0_42], %187 {strides = array<i32>} : memref<8x2x32xf32, #tpu.memory_space<vmem>>, vector<1x2x32xf32>,
    %c0_43 = arith.constant 0 : index
    %c0_44 = arith.constant 0 : index
    %188 = vector.load %arg5[%c0_43, %c0_44] : memref<32x128xbf16, #tpu.memory_space<vmem>>, vector<32x128xbf16>
    %c0_45 = arith.constant 0 : index
    %c0_46 = arith.constant 0 : index
    %189 = vector.load %arg6[%c0_45, %c0_46] : memref<32x128xf32, #tpu.memory_space<vmem>>, vector<32x128xf32>
    %c0_47 = arith.constant 0 : index
    %c0_48 = arith.constant 0 : index
    %190 = vector.load %arg7[%c0_47, %c0_48] : memref<1x128xf32, #tpu.memory_space<vmem>>, vector<1x128xf32>
    %c0_49 = arith.constant 0 : index
    %c0_50 = arith.constant 0 : index
    %c0_51 = arith.constant 0 : index
    %191 = vector.load %arg13[%c0_49, %c0_50, %c0_51] : memref<8x2x32xf32, #tpu.memory_space<vmem>>, vector<8x2x32xf32>
    %192 = vector.shape_cast %191 : vector<8x2x32xf32> to vector<16x32xf32>
    %193 = arith.truncf %192 : vector<16x32xf32> to vector<16x32xbf16>
    %cst_52 = arith.constant dense<0.000000e+00> : vector<16x128xf32>
    %194 = tpu.matmul %193, %188, %cst_52 {dimension_numbers = #tpu.dot_dimension_numbers<[1], [0], [0], [1], [0, 0, 1, 1], [], []>} : vector<16x32xbf16>, vector<32x128xbf16>, vector<16x128xf32> -> vector<16x128xf32>
    %195 = vector.broadcast %190 : vector<1x128xf32> to vector<16x128xf32>
    %196 = arith.addf %194, %195 : vector<16x128xf32>
    %197 = vector.shape_cast %196 : vector<16x128xf32> to vector<8x2x128xf32>
    %cst_53 = arith.constant 0.000000e+00 : f32
    %198 = vector.broadcast %cst_53 : f32 to vector<2x32xf32>
    %cst_54 = arith.constant 0.000000e+00 : f32
    %199 = vector.broadcast %cst_54 : f32 to vector<2x32xf32>
    %200 = vector.extract_strided_slice %197 {offsets = [0, 0, 0], sizes = [1, 2, 128], strides = [1, 1, 1]} : vector<8x2x128xf32> to vector<1x2x128xf32>
    %201 = vector.shape_cast %200 : vector<1x2x128xf32> to vector<2x128xf32>
    %cst_55 = arith.constant dense<0.000000e+00> : vector<2x128xf32>
    %202 = tpu.matmul %198, %189, %cst_55 {dimension_numbers = #tpu.dot_dimension_numbers<[1], [0], [0], [1], [0, 0, 1, 1], [], []>} : vector<2x32xf32>, vector<32x128xf32>, vector<2x128xf32> -> vector<2x128xf32>
    %203 = arith.addf %201, %202 : vector<2x128xf32>
    %204 = arith.negf %203 : vector<2x128xf32>
    %205 = math.exp %204 : vector<2x128xf32>
    %cst_56 = arith.constant 1.000000e+00 : f32
    %206 = vector.broadcast %cst_56 : f32 to vector<2x128xf32>
    %207 = arith.addf %206, %205 : vector<2x128xf32>
    %208 = arith.divf %206, %207 : vector<2x128xf32>
    %209 = math.tanh %203 : vector<2x128xf32>
    %210 = vector.extract_strided_slice %208 {offsets = [0, 0], sizes = [2, 32], strides = [1, 1]} : vector<2x128xf32> to vector<2x32xf32>
    %211 = vector.extract_strided_slice %208 {offsets = [0, 32], sizes = [2, 32], strides = [1, 1]} : vector<2x128xf32> to vector<2x32xf32>
    %212 = vector.extract_strided_slice %209 {offsets = [0, 64], sizes = [2, 32], strides = [1, 1]} : vector<2x128xf32> to vector<2x32xf32>
    %213 = vector.extract_strided_slice %208 {offsets = [0, 96], sizes = [2, 32], strides = [1, 1]} : vector<2x128xf32> to vector<2x32xf32>
    %214 = arith.mulf %211, %199 : vector<2x32xf32>
    %215 = arith.mulf %210, %212 : vector<2x32xf32>
    %216 = arith.addf %214, %215 : vector<2x32xf32>
    %217 = math.tanh %216 : vector<2x32xf32>
    %218 = arith.mulf %213, %217 : vector<2x32xf32>
    %219 = vector.extract_strided_slice %197 {offsets = [1, 0, 0], sizes = [1, 2, 128], strides = [1, 1, 1]} : vector<8x2x128xf32> to vector<1x2x128xf32>
    %220 = vector.shape_cast %219 : vector<1x2x128xf32> to vector<2x128xf32>
    %cst_57 = arith.constant dense<0.000000e+00> : vector<2x128xf32>
    %221 = tpu.matmul %218, %189, %cst_57 {dimension_numbers = #tpu.dot_dimension_numbers<[1], [0], [0], [1], [0, 0, 1, 1], [], []>} : vector<2x32xf32>, vector<32x128xf32>, vector<2x128xf32> -> vector<2x128xf32>
    %222 = arith.addf %220, %221 : vector<2x128xf32>
    %223 = arith.negf %222 : vector<2x128xf32>
    %224 = math.exp %223 : vector<2x128xf32>
    %cst_58 = arith.constant 1.000000e+00 : f32
    %225 = vector.broadcast %cst_58 : f32 to vector<2x128xf32>
    %226 = arith.addf %225, %224 : vector<2x128xf32>
    %227 = arith.divf %225, %226 : vector<2x128xf32>
    %228 = math.tanh %222 : vector<2x128xf32>
    %229 = vector.extract_strided_slice %227 {offsets = [0, 0], sizes = [2, 32], strides = [1, 1]} : vector<2x128xf32> to vector<2x32xf32>
    %230 = vector.extract_strided_slice %227 {offsets = [0, 32], sizes = [2, 32], strides = [1, 1]} : vector<2x128xf32> to vector<2x32xf32>
    %231 = vector.extract_strided_slice %228 {offsets = [0, 64], sizes = [2, 32], strides = [1, 1]} : vector<2x128xf32> to vector<2x32xf32>
    %232 = vector.extract_strided_slice %227 {offsets = [0, 96], sizes = [2, 32], strides = [1, 1]} : vector<2x128xf32> to vector<2x32xf32>
    %233 = arith.mulf %230, %216 : vector<2x32xf32>
    %234 = arith.mulf %229, %231 : vector<2x32xf32>
    %235 = arith.addf %233, %234 : vector<2x32xf32>
    %236 = math.tanh %235 : vector<2x32xf32>
    %237 = arith.mulf %232, %236 : vector<2x32xf32>
    %238 = vector.extract_strided_slice %197 {offsets = [2, 0, 0], sizes = [1, 2, 128], strides = [1, 1, 1]} : vector<8x2x128xf32> to vector<1x2x128xf32>
    %239 = vector.shape_cast %238 : vector<1x2x128xf32> to vector<2x128xf32>
    %cst_59 = arith.constant dense<0.000000e+00> : vector<2x128xf32>
    %240 = tpu.matmul %237, %189, %cst_59 {dimension_numbers = #tpu.dot_dimension_numbers<[1], [0], [0], [1], [0, 0, 1, 1], [], []>} : vector<2x32xf32>, vector<32x128xf32>, vector<2x128xf32> -> vector<2x128xf32>
    %241 = arith.addf %239, %240 : vector<2x128xf32>
    %242 = arith.negf %241 : vector<2x128xf32>
    %243 = math.exp %242 : vector<2x128xf32>
    %cst_60 = arith.constant 1.000000e+00 : f32
    %244 = vector.broadcast %cst_60 : f32 to vector<2x128xf32>
    %245 = arith.addf %244, %243 : vector<2x128xf32>
    %246 = arith.divf %244, %245 : vector<2x128xf32>
    %247 = math.tanh %241 : vector<2x128xf32>
    %248 = vector.extract_strided_slice %246 {offsets = [0, 0], sizes = [2, 32], strides = [1, 1]} : vector<2x128xf32> to vector<2x32xf32>
    %249 = vector.extract_strided_slice %246 {offsets = [0, 32], sizes = [2, 32], strides = [1, 1]} : vector<2x128xf32> to vector<2x32xf32>
    %250 = vector.extract_strided_slice %247 {offsets = [0, 64], sizes = [2, 32], strides = [1, 1]} : vector<2x128xf32> to vector<2x32xf32>
    %251 = vector.extract_strided_slice %246 {offsets = [0, 96], sizes = [2, 32], strides = [1, 1]} : vector<2x128xf32> to vector<2x32xf32>
    %252 = arith.mulf %249, %235 : vector<2x32xf32>
    %253 = arith.mulf %248, %250 : vector<2x32xf32>
    %254 = arith.addf %252, %253 : vector<2x32xf32>
    %255 = math.tanh %254 : vector<2x32xf32>
    %256 = arith.mulf %251, %255 : vector<2x32xf32>
    %257 = vector.extract_strided_slice %197 {offsets = [3, 0, 0], sizes = [1, 2, 128], strides = [1, 1, 1]} : vector<8x2x128xf32> to vector<1x2x128xf32>
    %258 = vector.shape_cast %257 : vector<1x2x128xf32> to vector<2x128xf32>
    %cst_61 = arith.constant dense<0.000000e+00> : vector<2x128xf32>
    %259 = tpu.matmul %256, %189, %cst_61 {dimension_numbers = #tpu.dot_dimension_numbers<[1], [0], [0], [1], [0, 0, 1, 1], [], []>} : vector<2x32xf32>, vector<32x128xf32>, vector<2x128xf32> -> vector<2x128xf32>
    %260 = arith.addf %258, %259 : vector<2x128xf32>
    %261 = arith.negf %260 : vector<2x128xf32>
    %262 = math.exp %261 : vector<2x128xf32>
    %cst_62 = arith.constant 1.000000e+00 : f32
    %263 = vector.broadcast %cst_62 : f32 to vector<2x128xf32>
    %264 = arith.addf %263, %262 : vector<2x128xf32>
    %265 = arith.divf %263, %264 : vector<2x128xf32>
    %266 = math.tanh %260 : vector<2x128xf32>
    %267 = vector.extract_strided_slice %265 {offsets = [0, 0], sizes = [2, 32], strides = [1, 1]} : vector<2x128xf32> to vector<2x32xf32>
    %268 = vector.extract_strided_slice %265 {offsets = [0, 32], sizes = [2, 32], strides = [1, 1]} : vector<2x128xf32> to vector<2x32xf32>
    %269 = vector.extract_strided_slice %266 {offsets = [0, 64], sizes = [2, 32], strides = [1, 1]} : vector<2x128xf32> to vector<2x32xf32>
    %270 = vector.extract_strided_slice %265 {offsets = [0, 96], sizes = [2, 32], strides = [1, 1]} : vector<2x128xf32> to vector<2x32xf32>
    %271 = arith.mulf %268, %254 : vector<2x32xf32>
    %272 = arith.mulf %267, %269 : vector<2x32xf32>
    %273 = arith.addf %271, %272 : vector<2x32xf32>
    %274 = math.tanh %273 : vector<2x32xf32>
    %275 = arith.mulf %270, %274 : vector<2x32xf32>
    %276 = vector.extract_strided_slice %197 {offsets = [4, 0, 0], sizes = [1, 2, 128], strides = [1, 1, 1]} : vector<8x2x128xf32> to vector<1x2x128xf32>
    %277 = vector.shape_cast %276 : vector<1x2x128xf32> to vector<2x128xf32>
    %cst_63 = arith.constant dense<0.000000e+00> : vector<2x128xf32>
    %278 = tpu.matmul %275, %189, %cst_63 {dimension_numbers = #tpu.dot_dimension_numbers<[1], [0], [0], [1], [0, 0, 1, 1], [], []>} : vector<2x32xf32>, vector<32x128xf32>, vector<2x128xf32> -> vector<2x128xf32>
    %279 = arith.addf %277, %278 : vector<2x128xf32>
    %280 = arith.negf %279 : vector<2x128xf32>
    %281 = math.exp %280 : vector<2x128xf32>
    %cst_64 = arith.constant 1.000000e+00 : f32
    %282 = vector.broadcast %cst_64 : f32 to vector<2x128xf32>
    %283 = arith.addf %282, %281 : vector<2x128xf32>
    %284 = arith.divf %282, %283 : vector<2x128xf32>
    %285 = math.tanh %279 : vector<2x128xf32>
    %286 = vector.extract_strided_slice %284 {offsets = [0, 0], sizes = [2, 32], strides = [1, 1]} : vector<2x128xf32> to vector<2x32xf32>
    %287 = vector.extract_strided_slice %284 {offsets = [0, 32], sizes = [2, 32], strides = [1, 1]} : vector<2x128xf32> to vector<2x32xf32>
    %288 = vector.extract_strided_slice %285 {offsets = [0, 64], sizes = [2, 32], strides = [1, 1]} : vector<2x128xf32> to vector<2x32xf32>
    %289 = vector.extract_strided_slice %284 {offsets = [0, 96], sizes = [2, 32], strides = [1, 1]} : vector<2x128xf32> to vector<2x32xf32>
    %290 = arith.mulf %287, %273 : vector<2x32xf32>
    %291 = arith.mulf %286, %288 : vector<2x32xf32>
    %292 = arith.addf %290, %291 : vector<2x32xf32>
    %293 = math.tanh %292 : vector<2x32xf32>
    %294 = arith.mulf %289, %293 : vector<2x32xf32>
    %295 = vector.extract_strided_slice %197 {offsets = [5, 0, 0], sizes = [1, 2, 128], strides = [1, 1, 1]} : vector<8x2x128xf32> to vector<1x2x128xf32>
    %296 = vector.shape_cast %295 : vector<1x2x128xf32> to vector<2x128xf32>
    %cst_65 = arith.constant dense<0.000000e+00> : vector<2x128xf32>
    %297 = tpu.matmul %294, %189, %cst_65 {dimension_numbers = #tpu.dot_dimension_numbers<[1], [0], [0], [1], [0, 0, 1, 1], [], []>} : vector<2x32xf32>, vector<32x128xf32>, vector<2x128xf32> -> vector<2x128xf32>
    %298 = arith.addf %296, %297 : vector<2x128xf32>
    %299 = arith.negf %298 : vector<2x128xf32>
    %300 = math.exp %299 : vector<2x128xf32>
    %cst_66 = arith.constant 1.000000e+00 : f32
    %301 = vector.broadcast %cst_66 : f32 to vector<2x128xf32>
    %302 = arith.addf %301, %300 : vector<2x128xf32>
    %303 = arith.divf %301, %302 : vector<2x128xf32>
    %304 = math.tanh %298 : vector<2x128xf32>
    %305 = vector.extract_strided_slice %303 {offsets = [0, 0], sizes = [2, 32], strides = [1, 1]} : vector<2x128xf32> to vector<2x32xf32>
    %306 = vector.extract_strided_slice %303 {offsets = [0, 32], sizes = [2, 32], strides = [1, 1]} : vector<2x128xf32> to vector<2x32xf32>
    %307 = vector.extract_strided_slice %304 {offsets = [0, 64], sizes = [2, 32], strides = [1, 1]} : vector<2x128xf32> to vector<2x32xf32>
    %308 = vector.extract_strided_slice %303 {offsets = [0, 96], sizes = [2, 32], strides = [1, 1]} : vector<2x128xf32> to vector<2x32xf32>
    %309 = arith.mulf %306, %292 : vector<2x32xf32>
    %310 = arith.mulf %305, %307 : vector<2x32xf32>
    %311 = arith.addf %309, %310 : vector<2x32xf32>
    %312 = math.tanh %311 : vector<2x32xf32>
    %313 = arith.mulf %308, %312 : vector<2x32xf32>
    %314 = vector.extract_strided_slice %197 {offsets = [6, 0, 0], sizes = [1, 2, 128], strides = [1, 1, 1]} : vector<8x2x128xf32> to vector<1x2x128xf32>
    %315 = vector.shape_cast %314 : vector<1x2x128xf32> to vector<2x128xf32>
    %cst_67 = arith.constant dense<0.000000e+00> : vector<2x128xf32>
    %316 = tpu.matmul %313, %189, %cst_67 {dimension_numbers = #tpu.dot_dimension_numbers<[1], [0], [0], [1], [0, 0, 1, 1], [], []>} : vector<2x32xf32>, vector<32x128xf32>, vector<2x128xf32> -> vector<2x128xf32>
    %317 = arith.addf %315, %316 : vector<2x128xf32>
    %318 = arith.negf %317 : vector<2x128xf32>
    %319 = math.exp %318 : vector<2x128xf32>
    %cst_68 = arith.constant 1.000000e+00 : f32
    %320 = vector.broadcast %cst_68 : f32 to vector<2x128xf32>
    %321 = arith.addf %320, %319 : vector<2x128xf32>
    %322 = arith.divf %320, %321 : vector<2x128xf32>
    %323 = math.tanh %317 : vector<2x128xf32>
    %324 = vector.extract_strided_slice %322 {offsets = [0, 0], sizes = [2, 32], strides = [1, 1]} : vector<2x128xf32> to vector<2x32xf32>
    %325 = vector.extract_strided_slice %322 {offsets = [0, 32], sizes = [2, 32], strides = [1, 1]} : vector<2x128xf32> to vector<2x32xf32>
    %326 = vector.extract_strided_slice %323 {offsets = [0, 64], sizes = [2, 32], strides = [1, 1]} : vector<2x128xf32> to vector<2x32xf32>
    %327 = vector.extract_strided_slice %322 {offsets = [0, 96], sizes = [2, 32], strides = [1, 1]} : vector<2x128xf32> to vector<2x32xf32>
    %328 = arith.mulf %325, %311 : vector<2x32xf32>
    %329 = arith.mulf %324, %326 : vector<2x32xf32>
    %330 = arith.addf %328, %329 : vector<2x32xf32>
    %331 = math.tanh %330 : vector<2x32xf32>
    %332 = arith.mulf %327, %331 : vector<2x32xf32>
    %333 = vector.extract_strided_slice %197 {offsets = [7, 0, 0], sizes = [1, 2, 128], strides = [1, 1, 1]} : vector<8x2x128xf32> to vector<1x2x128xf32>
    %334 = vector.shape_cast %333 : vector<1x2x128xf32> to vector<2x128xf32>
    %cst_69 = arith.constant dense<0.000000e+00> : vector<2x128xf32>
    %335 = tpu.matmul %332, %189, %cst_69 {dimension_numbers = #tpu.dot_dimension_numbers<[1], [0], [0], [1], [0, 0, 1, 1], [], []>} : vector<2x32xf32>, vector<32x128xf32>, vector<2x128xf32> -> vector<2x128xf32>
    %336 = arith.addf %334, %335 : vector<2x128xf32>
    %337 = arith.negf %336 : vector<2x128xf32>
    %338 = math.exp %337 : vector<2x128xf32>
    %cst_70 = arith.constant 1.000000e+00 : f32
    %339 = vector.broadcast %cst_70 : f32 to vector<2x128xf32>
    %340 = arith.addf %339, %338 : vector<2x128xf32>
    %341 = arith.divf %339, %340 : vector<2x128xf32>
    %342 = math.tanh %336 : vector<2x128xf32>
    %343 = vector.extract_strided_slice %341 {offsets = [0, 0], sizes = [2, 32], strides = [1, 1]} : vector<2x128xf32> to vector<2x32xf32>
    %344 = vector.extract_strided_slice %341 {offsets = [0, 32], sizes = [2, 32], strides = [1, 1]} : vector<2x128xf32> to vector<2x32xf32>
    %345 = vector.extract_strided_slice %342 {offsets = [0, 64], sizes = [2, 32], strides = [1, 1]} : vector<2x128xf32> to vector<2x32xf32>
    %346 = vector.extract_strided_slice %341 {offsets = [0, 96], sizes = [2, 32], strides = [1, 1]} : vector<2x128xf32> to vector<2x32xf32>
    %347 = arith.mulf %344, %330 : vector<2x32xf32>
    %348 = arith.mulf %343, %345 : vector<2x32xf32>
    %349 = arith.addf %347, %348 : vector<2x32xf32>
    %350 = math.tanh %349 : vector<2x32xf32>
    %351 = arith.mulf %346, %350 : vector<2x32xf32>
    %352 = arith.truncf %351 : vector<2x32xf32> to vector<2x32xbf16>
    %c0_71 = arith.constant 0 : index
    %c0_72 = arith.constant 0 : index
    %353 = vector.load %arg8[%c0_71, %c0_72] : memref<32x128xbf16, #tpu.memory_space<vmem>>, vector<32x128xbf16>
    %cst_73 = arith.constant dense<0.000000e+00> : vector<2x128xf32>
    %354 = tpu.matmul %352, %353, %cst_73 {dimension_numbers = #tpu.dot_dimension_numbers<[1], [0], [0], [1], [0, 0, 1, 1], [], []>} : vector<2x32xbf16>, vector<32x128xbf16>, vector<2x128xf32> -> vector<2x128xf32>
    %c0_74 = arith.constant 0 : index
    %c0_75 = arith.constant 0 : index
    %355 = vector.load %arg9[%c0_74, %c0_75] : memref<1x128xf32, #tpu.memory_space<vmem>>, vector<1x128xf32>
    %356 = vector.broadcast %355 : vector<1x128xf32> to vector<2x128xf32>
    %357 = arith.addf %354, %356 : vector<2x128xf32>
    %cst_76 = arith.constant 0.000000e+00 : f32
    %358 = vector.broadcast %cst_76 : f32 to vector<2x128xf32>
    %359 = arith.maximumf %357, %358 : vector<2x128xf32>
    %360 = arith.truncf %359 : vector<2x128xf32> to vector<2x128xbf16>
    %c0_77 = arith.constant 0 : index
    %c0_78 = arith.constant 0 : index
    %361 = vector.load %arg10[%c0_77, %c0_78] : memref<128x128xbf16, #tpu.memory_space<vmem>>, vector<128x128xbf16>
    %cst_79 = arith.constant dense<0.000000e+00> : vector<2x128xf32>
    %362 = tpu.matmul %360, %361, %cst_79 {dimension_numbers = #tpu.dot_dimension_numbers<[1], [0], [0], [1], [0, 0, 1, 1], [], []>} : vector<2x128xbf16>, vector<128x128xbf16>, vector<2x128xf32> -> vector<2x128xf32>
    %c0_80 = arith.constant 0 : index
    %c0_81 = arith.constant 0 : index
    %363 = vector.load %arg11[%c0_80, %c0_81] : memref<1x128xf32, #tpu.memory_space<vmem>>, vector<1x128xf32>
    %364 = vector.broadcast %363 : vector<1x128xf32> to vector<2x128xf32>
    %365 = arith.addf %362, %364 : vector<2x128xf32>
    %c0_82 = arith.constant 0 : index
    %c0_83 = arith.constant 0 : index
    %366 = vector.load %arg12[%c0_82, %c0_83] : memref<2x128xf32, #tpu.memory_space<vmem>>, vector<2x128xf32>
    tpu.vector_store %arg12[%c0_82, %c0_83], %365 {strides = array<i32>} : memref<2x128xf32, #tpu.memory_space<vmem>>, vector<2x128xf32>,
    return
  }
  func.func @transform_0(%arg0: i32) -> (i32, i32, i32) {
    %c0_i32 = arith.constant 0 : i32
    %c0_i32_0 = arith.constant 0 : i32
    %c0_i32_1 = arith.constant 0 : i32
    return %c0_i32, %arg0, %c0_i32_0 : i32, i32, i32
  }
  func.func @transform_1(%arg0: i32) -> (i32, i32) {
    %c0_i32 = arith.constant 0 : i32
    %c0_i32_0 = arith.constant 0 : i32
    %c0_i32_1 = arith.constant 0 : i32
    return %c0_i32, %c0_i32_0 : i32, i32
  }
  func.func @transform_2(%arg0: i32) -> (i32, i32) {
    %c0_i32 = arith.constant 0 : i32
    %c0_i32_0 = arith.constant 0 : i32
    %c0_i32_1 = arith.constant 0 : i32
    return %c0_i32, %c0_i32_0 : i32, i32
  }
  func.func @transform_3(%arg0: i32) -> (i32, i32) {
    %c0_i32 = arith.constant 0 : i32
    %c0_i32_0 = arith.constant 0 : i32
    %c0_i32_1 = arith.constant 0 : i32
    return %c0_i32, %c0_i32_0 : i32, i32
  }
  func.func @transform_4(%arg0: i32) -> (i32, i32) {
    %c0_i32 = arith.constant 0 : i32
    %c0_i32_0 = arith.constant 0 : i32
    %c0_i32_1 = arith.constant 0 : i32
    return %c0_i32, %c0_i32_0 : i32, i32
  }
  func.func @transform_5(%arg0: i32) -> (i32, i32) {
    %c0_i32 = arith.constant 0 : i32
    %c0_i32_0 = arith.constant 0 : i32
    %c0_i32_1 = arith.constant 0 : i32
    return %c0_i32, %c0_i32_0 : i32, i32
  }
  func.func @transform_6(%arg0: i32) -> (i32, i32) {
    %c0_i32 = arith.constant 0 : i32
    %c0_i32_0 = arith.constant 0 : i32
    %c0_i32_1 = arith.constant 0 : i32
    return %c0_i32, %c0_i32_0 : i32, i32
  }
  func.func @transform_7(%arg0: i32) -> (i32, i32) {
    %c0_i32 = arith.constant 0 : i32
    %c0_i32_0 = arith.constant 0 : i32
    %c0_i32_1 = arith.constant 0 : i32
    return %c0_i32, %c0_i32_0 : i32, i32
  }
  func.func @transform_8(%arg0: i32) -> (i32, i32) {
    %c0_i32 = arith.constant 0 : i32
    %c0_i32_0 = arith.constant 0 : i32
    %c0_i32_1 = arith.constant 0 : i32
    return %c0_i32, %c0_i32_0 : i32, i32
  }
  func.func @transform_9(%arg0: i32) -> (i32, i32) {
    %c0_i32 = arith.constant 0 : i32
    %c0_i32_0 = arith.constant 0 : i32
    %c0_i32_1 = arith.constant 0 : i32
    return %c0_i32, %c0_i32_0 : i32, i32
  }
  func.func @transform_10(%arg0: i32) -> (i32, i32) {
    %c0_i32 = arith.constant 0 : i32
    %c0_i32_0 = arith.constant 0 : i32
    %c0_i32_1 = arith.constant 0 : i32
    return %c0_i32, %c0_i32_0 : i32, i32
  }
  func.func @transform_11(%arg0: i32) -> (i32, i32) {
    %c0_i32 = arith.constant 0 : i32
    %c0_i32_0 = arith.constant 0 : i32
    return %arg0, %c0_i32 : i32, i32
  }
}

</mosaic_0001>

<bundles_post_ra>
// kernel: tpu_custom_call.1
= control target key start
LH: loop header
LB: loop body
LE: loop exit
PB: predicated region body
PF: predicated region fallthrough
CT: control target
= control target key end

     0   :  { %16 = vsyncpa [#allocation4], 0  ;;  %s3641_s0 = inlined_call_operand.hbm [shape: f32[8,2,32], index: 0, kind: input, shape index: {}]   ;;  %s3642_s1 = inlined_call_operand.hbm [shape: bf16[32,128], index: 1, kind: input, shape index: {}]   ;;  %s3643_s2 = inlined_call_operand.hbm [shape: f32[32,128], index: 2, kind: input, shape index: {}]   ;;  %s3644_s3 = inlined_call_operand.vmem [shape: f32[1,128], index: 3, kind: input, shape index: {}]   ;;  %s3645_s4 = inlined_call_operand.hbm [shape: bf16[32,128], index: 4, kind: input, shape index: {}]   ;;  %s3646_s5 = inlined_call_operand.hbm [shape: f32[32,128], index: 5, kind: input, shape index: {}]   ;;  %s3647_s6 = inlined_call_operand.vmem [shape: f32[1,128], index: 6, kind: input, shape index: {}]   ;;  %s3648_s7 = inlined_call_operand.vmem [shape: bf16[32,128], index: 7, kind: input, shape index: {}]   ;;  %s3649_s8 = inlined_call_operand.vmem [shape: f32[1,128], index: 8, kind: input, shape index: {}]   ;;  %s3650_s9 = inlined_call_operand.hbm [shape: bf16[128,128], index: 9, kind: input, shape index: {}]   ;;  %s3651_s10 = inlined_call_operand.vmem [shape: f32[1,128], index: 10, kind: input, shape index: {}]   ;;  %s3652_s11 = inlined_call_operand.hbm [shape: f32[2,128], index: 11, kind: output, shape index: {}]  }
   0x1   :  { %17 = vsyncpa [#allocation7], 0 }
   0x2   :  { %18 = vsyncpa [#allocation10], 0 }
   0x3   :  { %19 = vsyncpa [#allocation13], 0 }
   0x4   :  { %20 = vsyncpa [#allocation5], 0  ;;  %s3174_s17 = smov [#allocation6]   ;;  %s3010_s21 = scalar_lea.hbm %s3642_s1, 256 }
   0x5   :  { %s38_s18 = sshll.u32 %s3174_s17, 4  ;;  %p3011_p0 = scmp.ne.s32.totalorder %s3642_s1, %s3010_s21  ;;  %s39_s18 = int_to_ptr.vmem [resolvable:$true] %s38_s18 }
   0x6   :  { %p3014_p1 = scmp.lt.u32.totalorder %s3010_s21, %s3642_s1 }
   0x8   :  { %p3016_p2 = pnand %p3014_p1, %p3011_p0 }
   0xa   :  { %3019 = shalt.err (!%p3016_p2)
}
   0xb   :  { %s3020_s26 = scalar_lea.vmem %s39_s18, 256  ;;  %p3025_p4 = scmp.lt.s32.totalorder %s39_s18, %s39_s18 }
   0xc   :  { %p3021_p3 = scmp.ne.s32.totalorder %s39_s18, %s3020_s26  ;;  %p3026_p5 = scmp.lt.s32.totalorder %s3020_s26, %s3020_s26 }
   0xe   :  { %p3027_p6 = por %p3026_p5, %p3025_p4 }
  0x10   :  { %p3028_p7 = pnand %p3027_p6, %p3021_p3 }
  0x12   :  { %3031 = shalt.err (!%p3028_p7)
}
  0x13   :  { %s3175_s27 = smov 64   ;;  %s3176_s28 = smov 4  }
  0x14   :  { %44 = dma.hbm_to_vmem [thread:$0]  %s3642_s1, 256, %s39_s18, [#allocation7], %s3175_s27, %s3175_s27, %s3176_s28  }
  0x15   :  { %s3177_s12 = smov [#allocation9]   ;;  %s3178_s14 = smov [#allocation3]  }
  0x16   :  { %s64_s13 = sshll.u32 %s3177_s12, 4  ;;  %s26_s15 = sshll.u32 %s3178_s14, 4  ;;  %s65_s13 = int_to_ptr.vmem [resolvable:$true] %s64_s13  ;;  %s27_s15 = int_to_ptr.vmem [resolvable:$true] %s26_s15 }
  0x17   :  { %s3032_s19 = scalar_lea.hbm %s3645_s4, 256 }
  0x18   :  { %p3033_p8 = scmp.ne.s32.totalorder %s3645_s4, %s3032_s19  ;;  %p3036_p9 = scmp.lt.u32.totalorder %s3032_s19, %s3645_s4 }
  0x1a   :  { %p3038_p10 = pnand %p3036_p9, %p3033_p8 }
  0x1c   :  { %3041 = shalt.err (!%p3038_p10)
}
  0x1d   :  { %s3042_s1 = scalar_lea.vmem %s65_s13, 256  ;;  %p3047_p12 = scmp.lt.s32.totalorder %s65_s13, %s65_s13 }
  0x1e   :  { %p3043_p11 = scmp.ne.s32.totalorder %s65_s13, %s3042_s1  ;;  %p3048_p13 = scmp.lt.s32.totalorder %s3042_s1, %s3042_s1 }
  0x20   :  { %p3049_p0 = por %p3048_p13, %p3047_p12 }
  0x22   :  { %p3050_p1 = pnand %p3049_p0, %p3043_p11 }
  0x24   :  { %3053 = shalt.err (!%p3050_p1)
}
  0x25   :  { %70 = dma.hbm_to_vmem [thread:$0]  %s3645_s4, 256, %s65_s13, [#allocation10], %s3175_s27, %s3175_s27, %s3176_s28  }
  0x26   :  { %s3054_s29 = scalar_lea.hbm %s3641_s0, 256 }
  0x27   :  { %p3055_p2 = scmp.ne.s32.totalorder %s3641_s0, %s3054_s29  ;;  %p3058_p3 = scmp.lt.u32.totalorder %s3054_s29, %s3641_s0 }
  0x29   :  { %p3060_p4 = pnand %p3058_p3, %p3055_p2 }
  0x2b   :  { %3063 = shalt.err (!%p3060_p4)
}
  0x2c   :  { %s3064_s17 = scalar_lea.vmem %s27_s15, 256  ;;  %p3069_p6 = scmp.lt.s32.totalorder %s27_s15, %s27_s15 }
  0x2d   :  { %p3065_p5 = scmp.ne.s32.totalorder %s27_s15, %s3064_s17  ;;  %p3070_p7 = scmp.lt.s32.totalorder %s3064_s17, %s3064_s17 }
  0x2f   :  { %p3071_p8 = por %p3070_p7, %p3069_p6 }
  0x31   :  { %p3072_p9 = pnand %p3071_p8, %p3065_p5 }
  0x33   :  { %3075 = shalt.err (!%p3072_p9)
}
  0x34   :  { %s3179_s4 = smov 32   ;;  %s3180_s13 = smov 2  }
  0x35   :  { %32 = dma.hbm_to_vmem [thread:$0]  %s3641_s0, 256, %s27_s15, [#allocation4], %s3179_s4, %s3179_s4, %s3180_s13  }
  0x36   :  { %s3181_s21 = smov [#allocation8]   ;;  %s3076_s18 = scalar_lea.hbm %s3643_s2, 512 }
  0x37   :  { %s50_s22 = sshll.u32 %s3181_s21, 4  ;;  %p3077_p10 = scmp.ne.s32.totalorder %s3643_s2, %s3076_s18  ;;  %s51_s22 = int_to_ptr.vmem [resolvable:$true] %s50_s22 }
  0x38   :  { %p3080_p11 = scmp.lt.u32.totalorder %s3076_s18, %s3643_s2 }
  0x3a   :  { %p3082_p12 = pnand %p3080_p11, %p3077_p10 }
  0x3c   :  { %3085 = shalt.err (!%p3082_p12)
}
  0x3d   :  { %s3086_s30 = scalar_lea.vmem %s51_s22, 512  ;;  %p3091_p0 = scmp.lt.s32.totalorder %s51_s22, %s51_s22 }
  0x3e   :  { %p3087_p13 = scmp.ne.s32.totalorder %s51_s22, %s3086_s30  ;;  %p3092_p1 = scmp.lt.s32.totalorder %s3086_s30, %s3086_s30 }
  0x40   :  { %p3093_p2 = por %p3092_p1, %p3091_p0 }
  0x42   :  { %p3094_p3 = pnand %p3093_p2, %p3087_p13 }
  0x44   :  { %3097 = shalt.err (!%p3094_p3)
}
  0x45   :  { %s3182_s0 = smov 128   ;;  %s3183_s15 = smov 8  }
  0x46   :  { %56 = dma.hbm_to_vmem [thread:$0]  %s3643_s2, 512, %s51_s22, [#allocation7], %s3182_s0, %s3182_s0, %s3183_s15  }
  0x47   :  { %s3184_s16 = smov [#allocation11]   ;;  %s3185_s13 = smov [#allocation12]  }
  0x48   :  { %s76_s17 = sshll.u32 %s3184_s16, 4  ;;  %s94_s19 = sshll.u32 %s3185_s13, 4  ;;  %s77_s17 = int_to_ptr.vmem [resolvable:$true] %s76_s17  ;;  %s3307_s19 = int_to_ptr.vmem [resolvable:$true] %s94_s19 }
  0x49   :  { %s3098_s23 = scalar_lea.hbm %s3646_s5, 512 }
  0x4a   :  { %p3099_p4 = scmp.ne.s32.totalorder %s3646_s5, %s3098_s23  ;;  %p3102_p5 = scmp.lt.u32.totalorder %s3098_s23, %s3646_s5 }
  0x4c   :  { %p3104_p6 = pnand %p3102_p5, %p3099_p4 }
  0x4e   :  { %3107 = shalt.err (!%p3104_p6)
}
  0x4f   :  { %s3108_s2 = scalar_lea.vmem %s77_s17, 512  ;;  %p3113_p8 = scmp.lt.s32.totalorder %s77_s17, %s77_s17 }
  0x50   :  { %p3109_p7 = scmp.ne.s32.totalorder %s77_s17, %s3108_s2  ;;  %p3114_p9 = scmp.lt.s32.totalorder %s3108_s2, %s3108_s2 }
  0x52   :  { %p3115_p10 = por %p3114_p9, %p3113_p8 }
  0x54   :  { %p3116_p11 = pnand %p3115_p10, %p3109_p7 }
  0x56   :  { %3119 = shalt.err (!%p3116_p11)
}
  0x57   :  { %82 = dma.hbm_to_vmem [thread:$0]  %s3646_s5, 512, %s77_s17, [#allocation10], %s3182_s0, %s3182_s0, %s3183_s15  }
  0x58   :  { %s3120_s12 = scalar_lea.hbm %s3650_s9, 1024 }
  0x59   :  { %p3121_p12 = scmp.ne.s32.totalorder %s3650_s9, %s3120_s12  ;;  %p3124_p13 = scmp.lt.u32.totalorder %s3120_s12, %s3650_s9 }
  0x5b   :  { %p3126_p0 = pnand %p3124_p13, %p3121_p12 }
  0x5d   :  { %3129 = shalt.err (!%p3126_p0)
}
  0x5e   :  { %s3130_s21 = scalar_lea.vmem %s3307_s19, 1024  ;;  %p3135_p2 = scmp.lt.s32.totalorder %s3307_s19, %s3307_s19 }
  0x5f   :  { %p3131_p1 = scmp.ne.s32.totalorder %s3307_s19, %s3130_s21  ;;  %p3136_p3 = scmp.lt.s32.totalorder %s3130_s21, %s3130_s21 }
  0x61   :  { %p3137_p4 = por %p3136_p3, %p3135_p2 }
  0x63   :  { %p3138_p5 = pnand %p3137_p4, %p3131_p1 }
  0x65   :  { %3141 = shalt.err (!%p3138_p5)
}
  0x66   :  { %100 = dma.hbm_to_vmem [thread:$0]  %s3650_s9, 1024, %s3307_s19, [#allocation13], %s3175_s27, %s3175_s27, %s3176_s28  }
  0x67   :  { %3164 = dma.done.wait [#allocation4], 256  }
  0x68   :  { %3165 = vsyncadd [#allocation4], 4294967040 }
  0x69   :  { %3166 = dma.done.wait [#allocation7], 768  }
  0x6a   :  { %3167 = vsyncadd [#allocation7], 4294966528 }
  0x6b   :  { %3168 = dma.done.wait [#allocation10], 768  }
  0x6c   :  { %3169 = vsyncadd [#allocation10], 4294966528 }
  0x6d   :  { %3170 = dma.done.wait [#allocation13], 1024  }
  0x6e   :  { %3171 = vsyncadd [#allocation13], 4294966272  ;;  %v152_v0 = vlaneseq  ;;  %v3186_v1 = vmov 0.0   ;;  %vm3187_vm0 = vmmov 0   ;;  %v3188_v2 = vmov 1983009808  }
  0x6f   :  { %2535 = vmatprep.subr.bf16.mxu0 %v3186_v1  ;;  %2539 = vmatprep.mubr.msk.bf16.mxu0 %vm3187_vm0, %v3186_v1  ;;  %v150_v3 = vunpack.c.l.s4 %v3188_v2  ;;  %v3189_v4 = vmov 0.0|0.0   ;;  %v2868_v7 = vld [vmem:[#allocation6] sm:$0xff]   ;;  %v2869_v8 = vld [vmem:[#allocation6 + $0x8] sm:$0xff]   ;;  %v122_v10 = vld [vmem:[#allocation3] sm:$0x3]  ;;  %vm202_vm1 = vcmask 261120  }
  0x70   :  { %2767 = vmatprep.subr.bf16.mxu1 %v3189_v4  ;;  %2573 = vmatprep.mubr.msk.f32.mxu1 %vm3187_vm0, %v3186_v1  ;;  %v153_v6 = vshrl.u32 %v152_v0, 7  ;;  %v123_v11 = vld [vmem:[#allocation3 + $0x2] sm:$0x3]  ;;  %v124_v12 = vld [vmem:[#allocation3 + $0x4] sm:$0x3]  ;;  %v135_v24 = vld [vmem:[#allocation8 + $0x8] sm:$0xff] }
  0x71   :  { %v151_v5 = vunpack.c.0.s8 %v150_v3  ;;  %2536 = vmatpush3.bf16.msra.mxu0 %v2868_v7  ;;  %v125_v13 = vld [vmem:[#allocation3 + $0x6] sm:$0x3]  ;;  %v126_v14 = vld [vmem:[#allocation3 + $0x8] sm:$0x3]  ;;  %v127_v15 = vld [vmem:[#allocation3 + $0xa] sm:$0x3]  ;;  %v147_v16 = vcombine.low %v122_v10, %v123_v11 }
  0x72   :  { %2537 = vmatprep.subr.bf16.mxu0 %v3186_v1  ;;  %v128_v17 = vld [vmem:[#allocation3 + $0xc] sm:$0x3]  ;;  %v129_v18 = vld [vmem:[#allocation3 + $0xe] sm:$0x3]  ;;  %v148_v19 = vcombine.low %v124_v12, %v125_v13  ;;  %v164_v20 = vcombine.low %v126_v14, %v127_v15  ;;  %v134_v21 = vld [vmem:[#allocation8] sm:$0xff]  ;;  %vm400_vm2 = vcmask 254976  }
  0x73   :  { %v3347_v9 = vsub.s32 %v151_v5, %v153_v6  ;;  %v165_v23 = vcombine.low %v128_v17, %v129_v18  ;;  %v136_v25 = vld [vmem:[#allocation8 + $0x10] sm:$0xff]  ;;  %v3353_v28 = vpack.c.bf16 %v135_v24, %v134_v21  ;;  %v137_v29 = vld [vmem:[#allocation8 + $0x18] sm:$0xff]  ;;  %s3190_s18 = smov [#allocation14]  }
  0x74   :  { %v3359_v33 = vpack.c.bf16 %v137_v29, %v136_v25  ;;  %v2386_v35 = vld [vmem:[%s3644_s3] ss:$0 sm:$0xff]  ;;  %s2374_s24 = sshll.u32 %s3190_s18, 4  ;;  %s2375_s24 = int_to_ptr.vmem [resolvable:$true] %s2374_s24 }
  0x75   :  { %v155_v22 = vrot.slane %v147_v16, %v3347_v9  ;;  %2538 = vmatpush3.bf16.msra.mxu0 %v2869_v8  ;;  %v162_v26 = vrot.slane %v148_v19, %v3347_v9  ;;  %v172_v27 = vrot.slane %v164_v20, %v3347_v9  ;;  %v179_v30 = vrot.slane %v165_v23, %v3347_v9  ;;  %p3147_p7 = scmp.lt.s32.totalorder %s2375_s24, %s2375_s24 }
  0x76   :  { %2755 = vmatprep.subr.bf16.mxu0 %v3189_v4  ;;  %2769 = vmatpush3.bf16.msra.mxu1 %v3353_v28 }
  0x77   :  { %v163_v31 = vcombine.low %v155_v22, %v162_v26  ;;  %v180_v32 = vcombine.low %v172_v27, %v179_v30  ;;  %2770 = vmatprep.subr.bf16.mxu1 %v3189_v4 }
  0x79   :  { %v183_v34 = vpack.c.bf16 %v180_v32, %v163_v31 }
  0x7a   :  { %2772 = vmatpush3.bf16.msra.mxu1 %v3359_v33 }
  0x7b   :  { %2540 = vmatmul.mubr.msk.bf16.vlgmr.msra.gmra.mrb[0].mxu0 %vm202_vm1, %v183_v34  ;;  %2779 = vmatprep.subr.bf16.mxu1 %v3189_v4 }
  0x7c   :  { %2757 = vmatpush3.bf16.msra.mxu0 %v3353_v28  ;;  %2551 = vmatprep.mubr.msk.f32.mxu0 %vm3187_vm0, %v3186_v1 }
  0x7d   :  { %2758 = vmatprep.subr.bf16.mxu0 %v3189_v4 }
  0x80   :  { %2760 = vmatpush3.bf16.msra.mxu0 %v3359_v33 }
  0x81   :  { %2761 = vmatprep.subr.bf16.mxu0 %v3189_v4 }
  0x83   :  { %2552 = vmatmul.mubr.f32.vlgmr.msra.gmra.mrb[4].mxu0 %v3186_v1 }
  0x84   :  { %2763 = vmatpush3.bf16.msra.mxu0 %v3353_v28  ;;  %2562 = vmatprep.mubr.msk.f32.mxu0 %vm3187_vm0, %v3186_v1 }
  0x85   :  { %2764 = vmatprep.subr.bf16.mxu0 %v3189_v4 }
  0x88   :  { %2766 = vmatpush3.bf16.msra.mxu0 %v3359_v33 }
  0x89   :  { %2773 = vmatprep.subr.bf16.mxu0 %v3189_v4 }
 0x14e   :  { %v240_v36 = vpop.f32.mrb[0].mxu0 }
 0x14f   :  { %v2541_v37 = vpop.f32.mrb[1].mxu0  ;;  %v3380_v39 = vadd.f32 %v2386_v35, %v240_v36 }
 0x150   :  { %v243_v38 = vpop.f32.mrb[2].mxu0 }
 0x151   :  { %v3382_v40 = vadd.f32 %v2386_v35, %v243_v38  ;;  %v2542_v41 = vpop.f32.mrb[3].mxu0  ;;  %v256_v42 = vrot.slane %v3380_v39, %v3347_v9  ;;  %v249_v19 = vcombine.high %v3380_v39, %v3380_v39 }
 0x153   :  { %v264_v61 = vcombine.high %v256_v42, %v256_v42  ;;  %v263_v20 = vrot.slane %v249_v19, %v3347_v9 }
 0x156   :  { %v360_v43 = vpop.f32.mrb[4].mxu0 }
 0x157   :  { %v364_v44 = vadd.f32 %v360_v43, %v256_v42  ;;  %v2553_v45 = vpop.f32.mrb[5].mxu0  ;;  %v265_v42 = vcombine.high %v263_v20, %v263_v20 }
 0x159   :  { %2882 = vtanh.f32 %v364_v44  ;;  %v2390_v47 = vmul.f32 -1.442695, %v364_v44 }
 0x15b   :  { %2884 = vpow2.f32 %v2390_v47 }
 0x163   :  { %v2883_v46 = vpop.eup %2882 }
 0x164   :  { %374 = vrot.lane.b32.xlu0 %v2883_v46, %s3175_s27 }
 0x165   :  { %v2885_v48 = vpop.eup %2884 }
 0x166   :  { %v368_v49 = vadd.f32 1.0, %v2885_v48 }
 0x168   :  { %2886 = vrcp.f32 %v368_v49 }
 0x172   :  { %v2887_v50 = vpop.eup %2886 }
 0x173   :  { %v372_v53 = vmul.f32 0.0, %v2887_v50 }
 0x1d6   :  { %v375_v51 = vpop.permute.xlu0 %374 }
 0x1d7   :  { %v377_v52 = vmul.f32 %v2887_v50, %v375_v51 }
 0x1d9   :  { %379 = vrot.lane.b32.xlu0 %v377_v52, %s3179_s4 }
 0x24b   :  { %v380_v54 = vpop.permute.xlu0 %379 }
 0x24c   :  { %v382_v55 = vadd.f32 %v380_v54, %v372_v53 }
 0x24e   :  { %2888 = vtanh.f32 %v382_v55 }
 0x258   :  { %v2889_v56 = vpop.eup %2888 }
 0x259   :  { %385 = vrot.lane.b32.xlu1 %v2889_v56, %s3175_s27 }
 0x2cb   :  { %v386_v57 = vpop.permute.xlu1 %385 }
 0x2cc   :  { %v388_v58 = vmul.f32 %v2887_v50, %v386_v57 }
 0x2ce   :  { %v396_v59 = vrot.slane %v388_v58, %v3347_v9 }
 0x2d0   :  { %397 = vrot.lane.b32.xlu1 %v396_v59, %s3179_s4 }
 0x342   :  { %v398_v60 = vpop.permute.xlu1 %397 }
 0x343   :  { %401 = vst.msk [vmem:[#allocation2] sm:$0x3] %vm400_vm2, %v398_v60  ;;  %2563 = vmatmul.mubr.msk.f32.vlgmr.msra.gmra.mrb[6].mxu0 %vm202_vm1, %v398_v60 }
 0x344   :  { %2775 = vmatpush3.bf16.msra.mxu0 %v3353_v28  ;;  %2584 = vmatprep.mubr.msk.f32.mxu0 %vm3187_vm0, %v3186_v1 }
 0x345   :  { %2776 = vmatprep.subr.bf16.mxu0 %v3189_v4 }
 0x348   :  { %2778 = vmatpush3.bf16.msra.mxu0 %v3359_v33 }
 0x349   :  { %2785 = vmatprep.subr.bf16.mxu0 %v3189_v4 }
 0x416   :  { %v470_v62 = vpop.f32.mrb[6].mxu0 }
 0x417   :  { %v474_v63 = vadd.f32 %v470_v62, %v264_v61  ;;  %v2564_v0 = vpop.f32.mrb[7].mxu0  ;;  %v273_v61 = vrot.slane %v3382_v40, %v3347_v9 }
 0x419   :  { %2890 = vtanh.f32 %v474_v63  ;;  %v2392_v3 = vmul.f32 -1.442695, %v474_v63  ;;  %v281_v19 = vcombine.high %v273_v61, %v273_v61 }
 0x41b   :  { %2892 = vpow2.f32 %v2392_v3 }
 0x423   :  { %v2891_v2 = vpop.eup %2890 }
 0x424   :  { %484 = vrot.lane.b32.xlu0 %v2891_v2, %s3175_s27 }
 0x425   :  { %v2893_v5 = vpop.eup %2892 }
 0x426   :  { %v478_v6 = vadd.f32 1.0, %v2893_v5 }
 0x428   :  { %2894 = vrcp.f32 %v478_v6 }
 0x432   :  { %v2895_v7 = vpop.eup %2894 }
 0x433   :  { %v482_v11 = vmul.f32 %v2895_v7, %v382_v55 }
 0x496   :  { %v485_v8 = vpop.permute.xlu0 %484 }
 0x497   :  { %v487_v10 = vmul.f32 %v2895_v7, %v485_v8 }
 0x499   :  { %489 = vrot.lane.b32.xlu1 %v487_v10, %s3179_s4 }
 0x50b   :  { %v490_v12 = vpop.permute.xlu1 %489 }
 0x50c   :  { %v492_v13 = vadd.f32 %v490_v12, %v482_v11 }
 0x50e   :  { %2896 = vtanh.f32 %v492_v13 }
 0x518   :  { %v2897_v14 = vpop.eup %2896 }
 0x519   :  { %495 = vrot.lane.b32.xlu0 %v2897_v14, %s3175_s27 }
 0x58b   :  { %v496_v15 = vpop.permute.xlu0 %495 }
 0x58c   :  { %v498_v16 = vmul.f32 %v2895_v7, %v496_v15 }
 0x58e   :  { %v506_v17 = vrot.slane %v498_v16, %v3347_v9 }
 0x590   :  { %507 = vrot.lane.b32.xlu1 %v506_v17, %s3179_s4 }
 0x602   :  { %v508_v18 = vpop.permute.xlu1 %507 }
 0x603   :  { %511 = vst.msk [vmem:[#allocation2 + $0x2] sm:$0x3] %vm400_vm2, %v508_v18  ;;  %2574 = vmatmul.mubr.msk.f32.vlgmr.msra.gmra.mrb[0].mxu1 %vm202_vm1, %v508_v18 }
 0x604   :  { %2781 = vmatpush3.bf16.msra.mxu1 %v3353_v28  ;;  %2595 = vmatprep.mubr.msk.f32.mxu1 %vm3187_vm0, %v3186_v1 }
 0x605   :  { %2782 = vmatprep.subr.bf16.mxu1 %v3189_v4 }
 0x608   :  { %2784 = vmatpush3.bf16.msra.mxu1 %v3359_v33 }
 0x609   :  { %2791 = vmatprep.subr.bf16.mxu1 %v3189_v4 }
 0x6d6   :  { %v580_v21 = vpop.f32.mrb[0].mxu1 }
 0x6d7   :  { %v584_v22 = vadd.f32 %v580_v21, %v263_v20  ;;  %v2575_v23 = vpop.f32.mrb[1].mxu1 }
 0x6d9   :  { %2898 = vtanh.f32 %v584_v22  ;;  %v2394_v25 = vmul.f32 -1.442695, %v584_v22 }
 0x6db   :  { %2900 = vpow2.f32 %v2394_v25 }
 0x6e3   :  { %v2899_v24 = vpop.eup %2898 }
 0x6e4   :  { %594 = vrot.lane.b32.xlu0 %v2899_v24, %s3175_s27 }
 0x6e5   :  { %v2901_v26 = vpop.eup %2900 }
 0x6e6   :  { %v588_v27 = vadd.f32 1.0, %v2901_v26 }
 0x6e8   :  { %2902 = vrcp.f32 %v588_v27 }
 0x6f2   :  { %v2903_v29 = vpop.eup %2902 }
 0x6f3   :  { %v592_v32 = vmul.f32 %v2903_v29, %v492_v13 }
 0x756   :  { %v595_v30 = vpop.permute.xlu0 %594 }
 0x757   :  { %v597_v31 = vmul.f32 %v2903_v29, %v595_v30 }
 0x759   :  { %599 = vrot.lane.b32.xlu1 %v597_v31, %s3179_s4 }
 0x7cb   :  { %v600_v34 = vpop.permute.xlu1 %599 }
 0x7cc   :  { %v602_v35 = vadd.f32 %v600_v34, %v592_v32 }
 0x7ce   :  { %2904 = vtanh.f32 %v602_v35 }
 0x7d8   :  { %v2905_v36 = vpop.eup %2904 }
 0x7d9   :  { %605 = vrot.lane.b32.xlu0 %v2905_v36, %s3175_s27 }
 0x84b   :  { %v606_v37 = vpop.permute.xlu0 %605 }
 0x84c   :  { %v608_v38 = vmul.f32 %v2903_v29, %v606_v37 }
 0x84e   :  { %v616_v39 = vrot.slane %v608_v38, %v3347_v9  ;;  %v266_v38 = vcombine.high %v3382_v40, %v3382_v40 }
 0x850   :  { %617 = vrot.lane.b32.xlu1 %v616_v39, %s3179_s4  ;;  %v280_v39 = vrot.slane %v266_v38, %v3347_v9 }
 0x8c2   :  { %v618_v41 = vpop.permute.xlu1 %617 }
 0x8c3   :  { %621 = vst.msk [vmem:[#allocation2 + $0x4] sm:$0x3] %vm400_vm2, %v618_v41  ;;  %2585 = vmatmul.mubr.msk.f32.vlgmr.msra.gmra.mrb[8].mxu0 %vm202_vm1, %v618_v41 }
 0x8c4   :  { %2787 = vmatpush3.bf16.msra.mxu0 %v3353_v28  ;;  %2606 = vmatprep.mubr.msk.f32.mxu0 %vm3187_vm0, %v3186_v1 }
 0x8c5   :  { %2788 = vmatprep.subr.bf16.mxu0 %v3189_v4 }
 0x8c8   :  { %2790 = vmatpush3.bf16.msra.mxu0 %v3359_v33 }
 0x8c9   :  { %2797 = vmatprep.subr.bf16.mxu0 %v3189_v4 }
 0x996   :  { %v690_v43 = vpop.f32.mrb[8].mxu0 }
 0x997   :  { %v694_v44 = vadd.f32 %v690_v43, %v265_v42  ;;  %v2586_v45 = vpop.f32.mrb[9].mxu0 }
 0x999   :  { %2906 = vtanh.f32 %v694_v44  ;;  %v2396_v47 = vmul.f32 -1.442695, %v694_v44 }
 0x99b   :  { %2908 = vpow2.f32 %v2396_v47 }
 0x9a3   :  { %v2907_v46 = vpop.eup %2906 }
 0x9a4   :  { %704 = vrot.lane.b32.xlu0 %v2907_v46, %s3175_s27 }
 0x9a5   :  { %v2909_v48 = vpop.eup %2908 }
 0x9a6   :  { %v698_v49 = vadd.f32 1.0, %v2909_v48 }
 0x9a8   :  { %2910 = vrcp.f32 %v698_v49 }
 0x9b2   :  { %v2911_v50 = vpop.eup %2910 }
 0x9b3   :  { %v702_v53 = vmul.f32 %v2911_v50, %v602_v35 }
 0xa16   :  { %v705_v51 = vpop.permute.xlu0 %704 }
 0xa17   :  { %v707_v52 = vmul.f32 %v2911_v50, %v705_v51 }
 0xa19   :  { %709 = vrot.lane.b32.xlu1 %v707_v52, %s3179_s4 }
 0xa8b   :  { %v710_v54 = vpop.permute.xlu1 %709 }
 0xa8c   :  { %v712_v55 = vadd.f32 %v710_v54, %v702_v53 }
 0xa8e   :  { %2912 = vtanh.f32 %v712_v55 }
 0xa98   :  { %v2913_v56 = vpop.eup %2912 }
 0xa99   :  { %715 = vrot.lane.b32.xlu0 %v2913_v56, %s3175_s27 }
 0xb0b   :  { %v716_v57 = vpop.permute.xlu0 %715 }
 0xb0c   :  { %v718_v58 = vmul.f32 %v2911_v50, %v716_v57 }
 0xb0e   :  { %v726_v59 = vrot.slane %v718_v58, %v3347_v9  ;;  %v282_v58 = vcombine.high %v280_v39, %v280_v39 }
 0xb10   :  { %727 = vrot.lane.b32.xlu1 %v726_v59, %s3179_s4 }
 0xb82   :  { %v728_v60 = vpop.permute.xlu1 %727 }
 0xb83   :  { %731 = vst.msk [vmem:[#allocation2 + $0x6] sm:$0x3] %vm400_vm2, %v728_v60  ;;  %2596 = vmatmul.mubr.msk.f32.vlgmr.msra.gmra.mrb[2].mxu1 %vm202_vm1, %v728_v60 }
 0xb84   :  { %2793 = vmatpush3.bf16.msra.mxu1 %v3353_v28  ;;  %2617 = vmatprep.mubr.msk.f32.mxu1 %vm3187_vm0, %v3186_v1 }
 0xb85   :  { %2794 = vmatprep.subr.bf16.mxu1 %v3189_v4 }
 0xb88   :  { %2796 = vmatpush3.bf16.msra.mxu1 %v3359_v33 }
 0xb89   :  { %2631 = vmatprep.subr.bf16.mxu1 %v3186_v1 }
 0xc56   :  { %v800_v62 = vpop.f32.mrb[2].mxu1 }
 0xc57   :  { %v804_v63 = vadd.f32 %v800_v62, %v273_v61  ;;  %v2597_v0 = vpop.f32.mrb[3].mxu1 }
 0xc59   :  { %2914 = vtanh.f32 %v804_v63  ;;  %v2398_v3 = vmul.f32 -1.442695, %v804_v63 }
 0xc5b   :  { %2916 = vpow2.f32 %v2398_v3 }
 0xc63   :  { %v2915_v2 = vpop.eup %2914 }
 0xc64   :  { %814 = vrot.lane.b32.xlu0 %v2915_v2, %s3175_s27 }
 0xc65   :  { %v2917_v5 = vpop.eup %2916 }
 0xc66   :  { %v808_v6 = vadd.f32 1.0, %v2917_v5 }
 0xc68   :  { %2918 = vrcp.f32 %v808_v6 }
 0xc72   :  { %v2919_v7 = vpop.eup %2918 }
 0xc73   :  { %v812_v11 = vmul.f32 %v2919_v7, %v712_v55 }
 0xcd6   :  { %v815_v8 = vpop.permute.xlu0 %814 }
 0xcd7   :  { %v817_v10 = vmul.f32 %v2919_v7, %v815_v8 }
 0xcd9   :  { %819 = vrot.lane.b32.xlu1 %v817_v10, %s3179_s4 }
 0xd4b   :  { %v820_v12 = vpop.permute.xlu1 %819 }
 0xd4c   :  { %v822_v13 = vadd.f32 %v820_v12, %v812_v11  ;;  %v2870_v12 = vld [vmem:[#allocation9] sm:$0xff]  }
 0xd4e   :  { %2920 = vtanh.f32 %v822_v13 }
 0xd58   :  { %v2921_v14 = vpop.eup %2920 }
 0xd59   :  { %825 = vrot.lane.b32.xlu0 %v2921_v14, %s3175_s27  ;;  %v1177_v14 = vld [vmem:[#allocation11 + $0x8] sm:$0xff] }
 0xdcb   :  { %v826_v15 = vpop.permute.xlu0 %825 }
 0xdcc   :  { %v828_v16 = vmul.f32 %v2919_v7, %v826_v15  ;;  %v2871_v15 = vld [vmem:[#allocation9 + $0x8] sm:$0xff]  }
 0xdce   :  { %v836_v17 = vrot.slane %v828_v16, %v3347_v9 }
 0xdd0   :  { %837 = vrot.lane.b32.xlu1 %v836_v17, %s3179_s4 }
 0xe42   :  { %v838_v18 = vpop.permute.xlu1 %837 }
 0xe43   :  { %841 = vst.msk [vmem:[#allocation2 + $0x8] sm:$0x3] %vm400_vm2, %v838_v18  ;;  %2607 = vmatmul.mubr.msk.f32.vlgmr.msra.gmra.mrb[10].mxu0 %vm202_vm1, %v838_v18 }
 0xe44   :  { %2799 = vmatpush3.bf16.msra.mxu0 %v3353_v28  ;;  %2628 = vmatprep.mubr.msk.f32.mxu0 %vm3187_vm0, %v3186_v1 }
 0xe45   :  { %2800 = vmatprep.subr.bf16.mxu0 %v3189_v4 }
 0xe48   :  { %2802 = vmatpush3.bf16.msra.mxu0 %v3359_v33 }
 0xe49   :  { %2803 = vmatprep.subr.bf16.mxu0 %v3189_v4 }
 0xf16   :  { %v910_v20 = vpop.f32.mrb[10].mxu0 }
 0xf17   :  { %v914_v21 = vadd.f32 %v910_v20, %v281_v19  ;;  %v2608_v22 = vpop.f32.mrb[11].mxu0  ;;  %v1178_v20 = vld [vmem:[#allocation11 + $0x10] sm:$0xff] }
 0xf19   :  { %2922 = vtanh.f32 %v914_v21  ;;  %v2400_v24 = vmul.f32 -1.442695, %v914_v21  ;;  %v1179_v21 = vld [vmem:[#allocation11 + $0x18] sm:$0xff] }
 0xf1a   :  { %v3488_v22 = vpack.c.bf16 %v1179_v21, %v1178_v20 }
 0xf1b   :  { %2924 = vpow2.f32 %v2400_v24  ;;  %v1184_v24 = vld [vmem:[#allocation2 + $0x6] sm:$0x3] }
 0xf23   :  { %v2923_v23 = vpop.eup %2922 }
 0xf24   :  { %924 = vrot.lane.b32.xlu0 %v2923_v23, %s3175_s27 }
 0xf25   :  { %v2925_v28 = vpop.eup %2924 }
 0xf26   :  { %v918_v25 = vadd.f32 1.0, %v2925_v28  ;;  %v1182_v28 = vld [vmem:[#allocation2 + $0x2] sm:$0x3] }
 0xf28   :  { %2926 = vrcp.f32 %v918_v25  ;;  %v1183_v25 = vld [vmem:[#allocation2 + $0x4] sm:$0x3] }
 0xf32   :  { %v2927_v26 = vpop.eup %2926 }
 0xf33   :  { %v922_v33 = vmul.f32 %v2927_v26, %v822_v13  ;;  %v1176_v13 = vld [vmem:[#allocation11] sm:$0xff] }
 0xf34   :  { %v3480_v16 = vpack.c.bf16 %v1177_v14, %v1176_v13 }
 0xf96   :  { %v925_v27 = vpop.permute.xlu0 %924 }
 0xf97   :  { %v927_v29 = vmul.f32 %v2927_v26, %v925_v27  ;;  %v1198_v27 = vcombine.low %v1183_v25, %v1184_v24 }
 0xf99   :  { %929 = vrot.lane.b32.xlu1 %v927_v29, %s3179_s4  ;;  %v1181_v29 = vld [vmem:[#allocation2] sm:$0x3] }
0x100b   :  { %v930_v30 = vpop.permute.xlu1 %929 }
0x100c   :  { %v932_v31 = vadd.f32 %v930_v30, %v922_v33  ;;  %v1185_v33 = vld [vmem:[#allocation2 + $0x8] sm:$0x3]  ;;  %v1197_v30 = vcombine.low %v1181_v29, %v1182_v28 }
0x100e   :  { %2928 = vtanh.f32 %v932_v31 }
0x1018   :  { %v2929_v32 = vpop.eup %2928 }
0x1019   :  { %935 = vrot.lane.b32.xlu0 %v2929_v32, %s3175_s27 }
0x108b   :  { %v936_v34 = vpop.permute.xlu0 %935 }
0x108c   :  { %v938_v35 = vmul.f32 %v2927_v26, %v936_v34 }
0x108e   :  { %v946_v36 = vrot.slane %v938_v35, %v3347_v9  ;;  %v1212_v35 = vrot.slane %v1198_v27, %v3347_v9 }
0x1090   :  { %947 = vrot.lane.b32.xlu1 %v946_v36, %s3179_s4 }
0x1102   :  { %v948_v37 = vpop.permute.xlu1 %947 }
0x1103   :  { %951 = vst.msk [vmem:[#allocation2 + $0xa] sm:$0x3] %vm400_vm2, %v948_v37  ;;  %2618 = vmatmul.mubr.msk.f32.vlgmr.msra.gmra.mrb[4].mxu1 %vm202_vm1, %v948_v37  ;;  %v1205_v37 = vrot.slane %v1197_v30, %v3347_v9 }
0x1104   :  { %2635 = vmatprep.mubr.msk.bf16.mxu1 %vm3187_vm0, %v3186_v1  ;;  %2632 = vmatpush3.bf16.msra.mxu1 %v2870_v12 }
0x1105   :  { %2633 = vmatprep.subr.bf16.mxu1 %v3186_v1 }
0x1108   :  { %2634 = vmatpush3.bf16.msra.mxu1 %v2871_v15 }
0x1109   :  { %2809 = vmatprep.subr.bf16.mxu1 %v3189_v4 }
0x110a   :  { %v1186_v26 = vld [vmem:[#allocation2 + $0xa] sm:$0x3] }
0x11d6   :  { %v1020_v41 = vpop.f32.mrb[4].mxu1 }
0x11d7   :  { %v1024_v42 = vadd.f32 %v1020_v41, %v280_v39  ;;  %v2619_v43 = vpop.f32.mrb[5].mxu1  ;;  %v1213_v41 = vcombine.low %v1205_v37, %v1212_v35 }
0x11d9   :  { %2930 = vtanh.f32 %v1024_v42  ;;  %v2402_v45 = vmul.f32 -1.442695, %v1024_v42 }
0x11db   :  { %2932 = vpow2.f32 %v2402_v45 }
0x11e3   :  { %v2931_v44 = vpop.eup %2930 }
0x11e4   :  { %1034 = vrot.lane.b32.xlu0 %v2931_v44, %s3175_s27 }
0x11e5   :  { %v2933_v46 = vpop.eup %2932 }
0x11e6   :  { %v1028_v47 = vadd.f32 1.0, %v2933_v46  ;;  %v2405_v46 = vld [vmem:[%s3647_s6] ss:$0 sm:$0xff] }
0x11e8   :  { %2934 = vrcp.f32 %v1028_v47 }
0x11f2   :  { %v2935_v48 = vpop.eup %2934 }
0x11f3   :  { %v1032_v40 = vmul.f32 %v2935_v48, %v932_v31  ;;  %v1214_v31 = vcombine.low %v1185_v33, %v1186_v26 }
0x11f5   :  { %v1222_v38 = vrot.slane %v1214_v31, %v3347_v9 }
0x1256   :  { %v1035_v49 = vpop.permute.xlu0 %1034 }
0x1257   :  { %v1037_v50 = vmul.f32 %v2935_v48, %v1035_v49 }
0x1259   :  { %1039 = vrot.lane.b32.xlu1 %v1037_v50, %s3179_s4 }
0x12cb   :  { %v1040_v51 = vpop.permute.xlu1 %1039 }
0x12cc   :  { %v1042_v52 = vadd.f32 %v1040_v51, %v1032_v40 }
0x12ce   :  { %2936 = vtanh.f32 %v1042_v52 }
0x12d8   :  { %v2937_v53 = vpop.eup %2936 }
0x12d9   :  { %1045 = vrot.lane.b32.xlu0 %v2937_v53, %s3175_s27 }
0x134b   :  { %v1046_v54 = vpop.permute.xlu0 %1045 }
0x134c   :  { %v1048_v55 = vmul.f32 %v2935_v48, %v1046_v54 }
0x134e   :  { %v1056_v56 = vrot.slane %v1048_v55, %v3347_v9 }
0x1350   :  { %1057 = vrot.lane.b32.xlu1 %v1056_v56, %s3179_s4 }
0x13c2   :  { %v1058_v57 = vpop.permute.xlu1 %1057 }
0x13c3   :  { %1061 = vst.msk [vmem:[#allocation2 + $0xc] sm:$0x3] %vm400_vm2, %v1058_v57  ;;  %2629 = vmatmul.mubr.msk.f32.vlgmr.msra.gmra.mrb[12].mxu0 %vm202_vm1, %v1058_v57 }
0x13c4   :  { %2647 = vmatprep.mubr.msk.f32.mxu0 %vm3187_vm0, %v3186_v1  ;;  %2805 = vmatpush3.bf16.msra.mxu0 %v3480_v16 }
0x13c5   :  { %2806 = vmatprep.subr.bf16.mxu0 %v3189_v4 }
0x13c8   :  { %2808 = vmatpush3.bf16.msra.mxu0 %v3488_v22 }
0x13c9   :  { %2815 = vmatprep.subr.bf16.mxu0 %v3189_v4 }
0x13ca   :  { %v1187_v32 = vld [vmem:[#allocation2 + $0xc] sm:$0x3] }
0x13cb   :  { %2648 = vmatmul.mubr.f32.vlgmr.msra.gmra.mrb[14].mxu0 %v3186_v1 }
0x13cc   :  { %2817 = vmatpush3.bf16.msra.mxu0 %v3480_v16  ;;  %2669 = vmatprep.mubr.msk.f32.mxu0 %vm3187_vm0, %v3186_v1 }
0x13cd   :  { %2818 = vmatprep.subr.bf16.mxu0 %v3189_v4 }
0x13d0   :  { %2820 = vmatpush3.bf16.msra.mxu0 %v3488_v22 }
0x13d1   :  { %2827 = vmatprep.subr.bf16.mxu0 %v3189_v4 }
0x1496   :  { %v1130_v59 = vpop.f32.mrb[12].mxu0 }
0x1497   :  { %v1134_v60 = vadd.f32 %v1130_v59, %v282_v58  ;;  %v2630_v61 = vpop.f32.mrb[13].mxu0 }
0x1499   :  { %2938 = vtanh.f32 %v1134_v60  ;;  %v2404_v63 = vmul.f32 -1.442695, %v1134_v60 }
0x149b   :  { %2940 = vpow2.f32 %v2404_v63 }
0x149e   :  { %v1406_v44 = vpop.f32.mrb[14].mxu0 }
0x149f   :  { %v2649_v45 = vpop.f32.mrb[15].mxu0 }
0x14a3   :  { %v2939_v62 = vpop.eup %2938 }
0x14a4   :  { %1144 = vrot.lane.b32.xlu0 %v2939_v62, %s3175_s27 }
0x14a5   :  { %v2941_v0 = vpop.eup %2940 }
0x14a6   :  { %v1138_v2 = vadd.f32 1.0, %v2941_v0 }
0x14a8   :  { %2942 = vrcp.f32 %v1138_v2 }
0x14b2   :  { %v2943_v3 = vpop.eup %2942 }
0x14b3   :  { %v1142_v7 = vmul.f32 %v2943_v3, %v1042_v52 }
0x1516   :  { %v1145_v5 = vpop.permute.xlu0 %1144 }
0x1517   :  { %v1147_v6 = vmul.f32 %v2943_v3, %v1145_v5 }
0x1519   :  { %1149 = vrot.lane.b32.xlu1 %v1147_v6, %s3179_s4 }
0x158b   :  { %v1150_v8 = vpop.permute.xlu1 %1149 }
0x158c   :  { %v1152_v10 = vadd.f32 %v1150_v8, %v1142_v7 }
0x158e   :  { %2944 = vtanh.f32 %v1152_v10 }
0x1598   :  { %v2945_v11 = vpop.eup %2944 }
0x1599   :  { %1155 = vrot.lane.b32.xlu0 %v2945_v11, %s3175_s27 }
0x160b   :  { %v1156_v17 = vpop.permute.xlu0 %1155 }
0x160c   :  { %v1158_v18 = vmul.f32 %v2943_v3, %v1156_v17 }
0x160e   :  { %v1166_v19 = vrot.slane %v1158_v18, %v3347_v9 }
0x1610   :  { %1167 = vrot.lane.b32.xlu1 %v1166_v19, %s3179_s4 }
0x1682   :  { %v1168_v23 = vpop.permute.xlu1 %1167 }
0x1683   :  { %1171 = vst.msk [vmem:[#allocation2 + $0xe] sm:$0x3] %vm400_vm2, %v1168_v23 }
0x168a   :  { %v1188_v34 = vld [vmem:[#allocation2 + $0xe] sm:$0x3] }
0x168b   :  { %v1215_v36 = vcombine.low %v1187_v32, %v1188_v34 }
0x168d   :  { %v1229_v39 = vrot.slane %v1215_v36, %v3347_v9 }
0x168f   :  { %v1230_v42 = vcombine.low %v1222_v38, %v1229_v39 }
0x1691   :  { %v1233_v43 = vpack.c.bf16 %v1230_v42, %v1213_v41 }
0x1693   :  { %2636 = vmatmul.mubr.msk.bf16.vlgmr.msra.gmra.mrb[8].mxu1 %vm202_vm1, %v1233_v43 }
0x1694   :  { %2811 = vmatpush3.bf16.msra.mxu1 %v3480_v16  ;;  %2658 = vmatprep.mubr.msk.f32.mxu1 %vm3187_vm0, %v3186_v1 }
0x1695   :  { %2812 = vmatprep.subr.bf16.mxu1 %v3189_v4 }
0x1698   :  { %2814 = vmatpush3.bf16.msra.mxu1 %v3488_v22 }
0x1699   :  { %2821 = vmatprep.subr.bf16.mxu1 %v3189_v4 }
0x1766   :  { %v1289_v47 = vpop.f32.mrb[8].mxu1 }
0x1767   :  { %v3514_v48 = vadd.f32 %v2405_v46, %v1289_v47  ;;  %v2637_v49 = vpop.f32.mrb[9].mxu1 }
0x1768   :  { %v1292_v50 = vpop.f32.mrb[10].mxu1 }
0x1769   :  { %v3516_v40 = vadd.f32 %v2405_v46, %v1292_v50  ;;  %v2638_v51 = vpop.f32.mrb[11].mxu1  ;;  %v1305_v52 = vrot.slane %v3514_v48, %v3347_v9  ;;  %v1298_v29 = vcombine.high %v3514_v48, %v3514_v48 }
0x176b   :  { %v1410_v53 = vadd.f32 %v1406_v44, %v1305_v52  ;;  %v1313_v7 = vcombine.high %v1305_v52, %v1305_v52  ;;  %v1312_v33 = vrot.slane %v1298_v29, %v3347_v9 }
0x176d   :  { %2946 = vtanh.f32 %v1410_v53  ;;  %v2409_v55 = vmul.f32 -1.442695, %v1410_v53  ;;  %v1314_v50 = vcombine.high %v1312_v33, %v1312_v33 }
0x176f   :  { %2948 = vpow2.f32 %v2409_v55 }
0x1777   :  { %v2947_v54 = vpop.eup %2946 }
0x1778   :  { %1420 = vrot.lane.b32.xlu0 %v2947_v54, %s3175_s27 }
0x1779   :  { %v2949_v56 = vpop.eup %2948 }
0x177a   :  { %v1414_v57 = vadd.f32 1.0, %v2949_v56 }
0x177c   :  { %2950 = vrcp.f32 %v1414_v57 }
0x1786   :  { %v2951_v58 = vpop.eup %2950 }
0x1787   :  { %v1418_v61 = vmul.f32 0.0, %v2951_v58 }
0x17ea   :  { %v1421_v59 = vpop.permute.xlu0 %1420 }
0x17eb   :  { %v1423_v60 = vmul.f32 %v2951_v58, %v1421_v59 }
0x17ed   :  { %1425 = vrot.lane.b32.xlu1 %v1423_v60, %s3179_s4 }
0x185f   :  { %v1426_v62 = vpop.permute.xlu1 %1425 }
0x1860   :  { %v1428_v63 = vadd.f32 %v1426_v62, %v1418_v61 }
0x1862   :  { %2952 = vtanh.f32 %v1428_v63 }
0x186c   :  { %v2953_v0 = vpop.eup %2952 }
0x186d   :  { %1431 = vrot.lane.b32.xlu0 %v2953_v0, %s3175_s27 }
0x18df   :  { %v1432_v2 = vpop.permute.xlu0 %1431 }
0x18e0   :  { %v1434_v3 = vmul.f32 %v2951_v58, %v1432_v2 }
0x18e2   :  { %v1442_v5 = vrot.slane %v1434_v3, %v3347_v9 }
0x18e4   :  { %1443 = vrot.lane.b32.xlu1 %v1442_v5, %s3179_s4 }
0x1956   :  { %v1444_v6 = vpop.permute.xlu1 %1443 }
0x1957   :  { %2659 = vmatmul.mubr.msk.f32.vlgmr.msra.gmra.mrb[6].mxu1 %vm202_vm1, %v1444_v6 }
0x1958   :  { %2823 = vmatpush3.bf16.msra.mxu1 %v3480_v16  ;;  %2680 = vmatprep.mubr.msk.f32.mxu1 %vm3187_vm0, %v3186_v1 }
0x1959   :  { %2824 = vmatprep.subr.bf16.mxu1 %v3189_v4 }
0x195c   :  { %2826 = vmatpush3.bf16.msra.mxu1 %v3488_v22 }
0x195d   :  { %2833 = vmatprep.subr.bf16.mxu1 %v3189_v4 }
0x1a2a   :  { %v1513_v8 = vpop.f32.mrb[6].mxu1 }
0x1a2b   :  { %v1517_v10 = vadd.f32 %v1513_v8, %v1313_v7  ;;  %v2660_v11 = vpop.f32.mrb[7].mxu1  ;;  %v1322_v7 = vrot.slane %v3516_v40, %v3347_v9 }
0x1a2d   :  { %2954 = vtanh.f32 %v1517_v10  ;;  %v2411_v13 = vmul.f32 -1.442695, %v1517_v10  ;;  %v1330_v29 = vcombine.high %v1322_v7, %v1322_v7 }
0x1a2f   :  { %2956 = vpow2.f32 %v2411_v13 }
0x1a37   :  { %v2955_v12 = vpop.eup %2954 }
0x1a38   :  { %1527 = vrot.lane.b32.xlu0 %v2955_v12, %s3175_s27 }
0x1a39   :  { %v2957_v14 = vpop.eup %2956 }
0x1a3a   :  { %v1521_v15 = vadd.f32 1.0, %v2957_v14 }
0x1a3c   :  { %2958 = vrcp.f32 %v1521_v15 }
0x1a46   :  { %v2959_v17 = vpop.eup %2958 }
0x1a47   :  { %v1525_v20 = vmul.f32 %v2959_v17, %v1428_v63 }
0x1aaa   :  { %v1528_v18 = vpop.permute.xlu0 %1527 }
0x1aab   :  { %v1530_v19 = vmul.f32 %v2959_v17, %v1528_v18 }
0x1aad   :  { %1532 = vrot.lane.b32.xlu1 %v1530_v19, %s3179_s4 }
0x1b1f   :  { %v1533_v21 = vpop.permute.xlu1 %1532 }
0x1b20   :  { %v1535_v23 = vadd.f32 %v1533_v21, %v1525_v20 }
0x1b22   :  { %2960 = vtanh.f32 %v1535_v23 }
0x1b2c   :  { %v2961_v24 = vpop.eup %2960 }
0x1b2d   :  { %1538 = vrot.lane.b32.xlu0 %v2961_v24, %s3175_s27 }
0x1b9f   :  { %v1539_v28 = vpop.permute.xlu0 %1538 }
0x1ba0   :  { %v1541_v25 = vmul.f32 %v2959_v17, %v1539_v28 }
0x1ba2   :  { %v1549_v26 = vrot.slane %v1541_v25, %v3347_v9 }
0x1ba4   :  { %1550 = vrot.lane.b32.xlu1 %v1549_v26, %s3179_s4 }
0x1c16   :  { %v1551_v27 = vpop.permute.xlu1 %1550 }
0x1c17   :  { %2670 = vmatmul.mubr.msk.f32.vlgmr.msra.gmra.mrb[16].mxu0 %vm202_vm1, %v1551_v27 }
0x1c18   :  { %2829 = vmatpush3.bf16.msra.mxu0 %v3480_v16  ;;  %2691 = vmatprep.mubr.msk.f32.mxu0 %vm3187_vm0, %v3186_v1 }
0x1c19   :  { %2830 = vmatprep.subr.bf16.mxu0 %v3189_v4 }
0x1c1c   :  { %2832 = vmatpush3.bf16.msra.mxu0 %v3488_v22 }
0x1c1d   :  { %2839 = vmatprep.subr.bf16.mxu0 %v3189_v4 }
0x1cea   :  { %v1620_v30 = vpop.f32.mrb[16].mxu0 }
0x1ceb   :  { %v1624_v31 = vadd.f32 %v1620_v30, %v1312_v33  ;;  %v2671_v32 = vpop.f32.mrb[17].mxu0 }
0x1ced   :  { %2962 = vtanh.f32 %v1624_v31  ;;  %v2413_v35 = vmul.f32 -1.442695, %v1624_v31 }
0x1cef   :  { %2964 = vpow2.f32 %v2413_v35 }
0x1cf7   :  { %v2963_v34 = vpop.eup %2962 }
0x1cf8   :  { %1634 = vrot.lane.b32.xlu0 %v2963_v34, %s3175_s27 }
0x1cf9   :  { %v2965_v36 = vpop.eup %2964 }
0x1cfa   :  { %v1628_v37 = vadd.f32 1.0, %v2965_v36 }
0x1cfc   :  { %2966 = vrcp.f32 %v1628_v37 }
0x1d06   :  { %v2967_v38 = vpop.eup %2966 }
0x1d07   :  { %v1632_v42 = vmul.f32 %v2967_v38, %v1535_v23 }
0x1d6a   :  { %v1635_v39 = vpop.permute.xlu0 %1634 }
0x1d6b   :  { %v1637_v41 = vmul.f32 %v2967_v38, %v1635_v39 }
0x1d6d   :  { %1639 = vrot.lane.b32.xlu1 %v1637_v41, %s3179_s4 }
0x1ddf   :  { %v1640_v43 = vpop.permute.xlu1 %1639 }
0x1de0   :  { %v1642_v44 = vadd.f32 %v1640_v43, %v1632_v42 }
0x1de2   :  { %2968 = vtanh.f32 %v1642_v44 }
0x1dec   :  { %v2969_v45 = vpop.eup %2968 }
0x1ded   :  { %1645 = vrot.lane.b32.xlu0 %v2969_v45, %s3175_s27 }
0x1e5f   :  { %v1646_v46 = vpop.permute.xlu0 %1645 }
0x1e60   :  { %v1648_v47 = vmul.f32 %v2967_v38, %v1646_v46  ;;  %v1315_v46 = vcombine.high %v3516_v40, %v3516_v40 }
0x1e62   :  { %v1656_v48 = vrot.slane %v1648_v47, %v3347_v9  ;;  %v1329_v47 = vrot.slane %v1315_v46, %v3347_v9 }
0x1e64   :  { %1657 = vrot.lane.b32.xlu1 %v1656_v48, %s3179_s4 }
0x1ed6   :  { %v1658_v49 = vpop.permute.xlu1 %1657 }
0x1ed7   :  { %2681 = vmatmul.mubr.msk.f32.vlgmr.msra.gmra.mrb[12].mxu1 %vm202_vm1, %v1658_v49 }
0x1ed8   :  { %2835 = vmatpush3.bf16.msra.mxu1 %v3480_v16  ;;  %2702 = vmatprep.mubr.msk.f32.mxu1 %vm3187_vm0, %v3186_v1 }
0x1ed9   :  { %2836 = vmatprep.subr.bf16.mxu1 %v3189_v4 }
0x1edc   :  { %2838 = vmatpush3.bf16.msra.mxu1 %v3488_v22 }
0x1edd   :  { %2845 = vmatprep.subr.bf16.mxu1 %v3189_v4 }
0x1faa   :  { %v1727_v51 = vpop.f32.mrb[12].mxu1 }
0x1fab   :  { %v1731_v52 = vadd.f32 %v1727_v51, %v1314_v50  ;;  %v2682_v53 = vpop.f32.mrb[13].mxu1 }
0x1fad   :  { %2970 = vtanh.f32 %v1731_v52  ;;  %v2415_v55 = vmul.f32 -1.442695, %v1731_v52 }
0x1faf   :  { %2972 = vpow2.f32 %v2415_v55 }
0x1fb7   :  { %v2971_v54 = vpop.eup %2970 }
0x1fb8   :  { %1741 = vrot.lane.b32.xlu0 %v2971_v54, %s3175_s27 }
0x1fb9   :  { %v2973_v56 = vpop.eup %2972 }
0x1fba   :  { %v1735_v57 = vadd.f32 1.0, %v2973_v56 }
0x1fbc   :  { %2974 = vrcp.f32 %v1735_v57 }
0x1fc6   :  { %v2975_v58 = vpop.eup %2974 }
0x1fc7   :  { %v1739_v61 = vmul.f32 %v2975_v58, %v1642_v44 }
0x202a   :  { %v1742_v59 = vpop.permute.xlu0 %1741 }
0x202b   :  { %v1744_v60 = vmul.f32 %v2975_v58, %v1742_v59 }
0x202d   :  { %1746 = vrot.lane.b32.xlu1 %v1744_v60, %s3179_s4 }
0x209f   :  { %v1747_v62 = vpop.permute.xlu1 %1746 }
0x20a0   :  { %v1749_v63 = vadd.f32 %v1747_v62, %v1739_v61 }
0x20a2   :  { %2976 = vtanh.f32 %v1749_v63 }
0x20ac   :  { %v2977_v0 = vpop.eup %2976 }
0x20ad   :  { %1752 = vrot.lane.b32.xlu0 %v2977_v0, %s3175_s27 }
0x211f   :  { %v1753_v2 = vpop.permute.xlu0 %1752 }
0x2120   :  { %v1755_v3 = vmul.f32 %v2975_v58, %v1753_v2  ;;  %v1331_v2 = vcombine.high %v1329_v47, %v1329_v47 }
0x2122   :  { %v1763_v5 = vrot.slane %v1755_v3, %v3347_v9 }
0x2124   :  { %1764 = vrot.lane.b32.xlu1 %v1763_v5, %s3179_s4 }
0x2196   :  { %v1765_v6 = vpop.permute.xlu1 %1764 }
0x2197   :  { %2692 = vmatmul.mubr.msk.f32.vlgmr.msra.gmra.mrb[18].mxu0 %vm202_vm1, %v1765_v6 }
0x2198   :  { %2841 = vmatpush3.bf16.msra.mxu0 %v3480_v16  ;;  %2713 = vmatprep.mubr.msk.f32.mxu0 %vm3187_vm0, %v3186_v1 }
0x2199   :  { %2842 = vmatprep.subr.bf16.mxu0 %v3189_v4 }
0x219c   :  { %2844 = vmatpush3.bf16.msra.mxu0 %v3488_v22 }
0x219d   :  { %2727 = vmatprep.subr.bf16.mxu0 %v3186_v1 }
0x226a   :  { %v1834_v8 = vpop.f32.mrb[18].mxu0 }
0x226b   :  { %v1838_v10 = vadd.f32 %v1834_v8, %v1322_v7  ;;  %v2693_v11 = vpop.f32.mrb[19].mxu0 }
0x226d   :  { %2978 = vtanh.f32 %v1838_v10  ;;  %v2417_v13 = vmul.f32 -1.442695, %v1838_v10 }
0x226f   :  { %2980 = vpow2.f32 %v2417_v13 }
0x2277   :  { %v2979_v12 = vpop.eup %2978 }
0x2278   :  { %1848 = vrot.lane.b32.xlu0 %v2979_v12, %s3175_s27 }
0x2279   :  { %v2981_v14 = vpop.eup %2980 }
0x227a   :  { %v1842_v15 = vadd.f32 1.0, %v2981_v14 }
0x227c   :  { %2982 = vrcp.f32 %v1842_v15 }
0x2286   :  { %v2983_v17 = vpop.eup %2982 }
0x2287   :  { %v1846_v20 = vmul.f32 %v2983_v17, %v1749_v63 }
0x22ea   :  { %v1849_v18 = vpop.permute.xlu0 %1848 }
0x22eb   :  { %v1851_v19 = vmul.f32 %v2983_v17, %v1849_v18  ;;  %v2872_v18 = vld [vmem:[%s3648_s7] sm:$0xff]  }
0x22ed   :  { %1853 = vrot.lane.b32.xlu1 %v1851_v19, %s3179_s4  ;;  %v2873_v19 = vld [vmem:[%s3648_s7 + $0x8] sm:$0xff]  }
0x235f   :  { %v1854_v21 = vpop.permute.xlu1 %1853 }
0x2360   :  { %v1856_v23 = vadd.f32 %v1854_v21, %v1846_v20  ;;  %v2874_v21 = vld [vmem:[#allocation12] sm:$0xff]  }
0x2362   :  { %2984 = vtanh.f32 %v1856_v23 }
0x236c   :  { %v2985_v24 = vpop.eup %2984 }
0x236d   :  { %1859 = vrot.lane.b32.xlu0 %v2985_v24, %s3175_s27  ;;  %v2876_v24 = vld [vmem:[#allocation12 + $0x10] sm:$0xff]  }
0x23df   :  { %v1860_v28 = vpop.permute.xlu0 %1859 }
0x23e0   :  { %v1862_v25 = vmul.f32 %v2983_v17, %v1860_v28 }
0x23e2   :  { %v1870_v26 = vrot.slane %v1862_v25, %v3347_v9 }
0x23e4   :  { %1871 = vrot.lane.b32.xlu1 %v1870_v26, %s3179_s4  ;;  %v2877_v26 = vld [vmem:[#allocation12 + $0x18] sm:$0xff]  }
0x2456   :  { %v1872_v27 = vpop.permute.xlu1 %1871 }
0x2457   :  { %2703 = vmatmul.mubr.msk.f32.vlgmr.msra.gmra.mrb[14].mxu1 %vm202_vm1, %v1872_v27 }
0x2458   :  { %2847 = vmatpush3.bf16.msra.mxu1 %v3480_v16  ;;  %2724 = vmatprep.mubr.msk.f32.mxu1 %vm3187_vm0, %v3186_v1 }
0x2459   :  { %2848 = vmatprep.subr.bf16.mxu1 %v3189_v4 }
0x245c   :  { %2850 = vmatpush3.bf16.msra.mxu1 %v3488_v22 }
0x245d   :  { %2735 = vmatprep.subr.bf16.mxu1 %v3186_v1 }
0x252a   :  { %v1941_v33 = vpop.f32.mrb[14].mxu1 }
0x252b   :  { %v1945_v30 = vadd.f32 %v1941_v33, %v1330_v29  ;;  %v2704_v31 = vpop.f32.mrb[15].mxu1  ;;  %v2878_v29 = vld [vmem:[#allocation12 + $0x20] sm:$0xff]   ;;  %v2879_v33 = vld [vmem:[#allocation12 + $0x28] sm:$0xff]  }
0x252c   :  { %v2880_v31 = vld [vmem:[#allocation12 + $0x30] sm:$0xff]  }
0x252d   :  { %2986 = vtanh.f32 %v1945_v30  ;;  %v2419_v34 = vmul.f32 -1.442695, %v1945_v30 }
0x252f   :  { %2988 = vpow2.f32 %v2419_v34  ;;  %v2424_v34 = vld [vmem:[%s3649_s8] ss:$0 sm:$0xff]  ;;  %s3142_s8 = scalar_lea.vmem %s2375_s24, 32 }
0x2530   :  { %p3143_p6 = scmp.ne.s32.totalorder %s2375_s24, %s3142_s8  ;;  %p3148_p8 = scmp.lt.s32.totalorder %s3142_s8, %s3142_s8 }
0x2532   :  { %p3149_p9 = por %p3148_p8, %p3147_p7 }
0x2534   :  { %p3150_p10 = pnand %p3149_p9, %p3143_p6 }
0x2537   :  { %v2987_v32 = vpop.eup %2986 }
0x2538   :  { %1955 = vrot.lane.b32.xlu0 %v2987_v32, %s3175_s27  ;;  %v2881_v32 = vld [vmem:[#allocation12 + $0x38] sm:$0xff]  }
0x2539   :  { %v2989_v16 = vpop.eup %2988 }
0x253a   :  { %v1949_v35 = vadd.f32 1.0, %v2989_v16 }
0x253c   :  { %2990 = vrcp.f32 %v1949_v35 }
0x2546   :  { %v2991_v36 = vpop.eup %2990 }
0x2547   :  { %v1953_v22 = vmul.f32 %v2991_v36, %v1856_v23  ;;  %v2875_v23 = vld [vmem:[#allocation12 + $0x8] sm:$0xff]  }
0x25aa   :  { %v1956_v37 = vpop.permute.xlu0 %1955 }
0x25ab   :  { %v1958_v4 = vmul.f32 %v2991_v36, %v1956_v37 }
0x25ad   :  { %1960 = vrot.lane.b32.xlu1 %v1958_v4, %s3179_s4 }
0x261f   :  { %v1961_v38 = vpop.permute.xlu1 %1960 }
0x2620   :  { %v1963_v39 = vadd.f32 %v1961_v38, %v1953_v22 }
0x2622   :  { %2992 = vtanh.f32 %v1963_v39 }
0x262c   :  { %v2993_v41 = vpop.eup %2992 }
0x262d   :  { %1966 = vrot.lane.b32.xlu0 %v2993_v41, %s3175_s27 }
0x269f   :  { %v1967_v42 = vpop.permute.xlu0 %1966 }
0x26a0   :  { %v1969_v43 = vmul.f32 %v2991_v36, %v1967_v42 }
0x26a2   :  { %v1977_v44 = vrot.slane %v1969_v43, %v3347_v9 }
0x26a4   :  { %1978 = vrot.lane.b32.xlu1 %v1977_v44, %s3179_s4 }
0x2716   :  { %v1979_v45 = vpop.permute.xlu1 %1978 }
0x2717   :  { %2714 = vmatmul.mubr.msk.f32.vlgmr.msra.gmra.mrb[20].mxu0 %vm202_vm1, %v1979_v45 }
0x2718   :  { %2731 = vmatprep.mubr.msk.bf16.mxu0 %vm3187_vm0, %v3186_v1  ;;  %2728 = vmatpush3.bf16.msra.mxu0 %v2872_v18 }
0x2719   :  { %2729 = vmatprep.subr.bf16.mxu0 %v3186_v1 }
0x271c   :  { %2730 = vmatpush3.bf16.msra.mxu0 %v2873_v19 }
0x27ea   :  { %v2048_v48 = vpop.f32.mrb[20].mxu0 }
0x27eb   :  { %v2052_v49 = vadd.f32 %v2048_v48, %v1329_v47  ;;  %v2715_v50 = vpop.f32.mrb[21].mxu0 }
0x27ed   :  { %2994 = vtanh.f32 %v2052_v49  ;;  %v2421_v52 = vmul.f32 -1.442695, %v2052_v49 }
0x27ef   :  { %2996 = vpow2.f32 %v2421_v52 }
0x27f7   :  { %v2995_v51 = vpop.eup %2994 }
0x27f8   :  { %2062 = vrot.lane.b32.xlu0 %v2995_v51, %s3175_s27 }
0x27f9   :  { %v2997_v53 = vpop.eup %2996 }
0x27fa   :  { %v2056_v54 = vadd.f32 1.0, %v2997_v53 }
0x27fc   :  { %2998 = vrcp.f32 %v2056_v54 }
0x2806   :  { %v2999_v55 = vpop.eup %2998 }
0x2807   :  { %v2060_v40 = vmul.f32 %v2999_v55, %v1963_v39  ;;  %v2428_v39 = vld [vmem:[%s3651_s10] ss:$0 sm:$0xff] }
0x286a   :  { %v2063_v56 = vpop.permute.xlu0 %2062 }
0x286b   :  { %v2065_v57 = vmul.f32 %v2999_v55, %v2063_v56 }
0x286d   :  { %2067 = vrot.lane.b32.xlu1 %v2065_v57, %s3179_s4 }
0x28df   :  { %v2068_v58 = vpop.permute.xlu1 %2067 }
0x28e0   :  { %v2070_v59 = vadd.f32 %v2068_v58, %v2060_v40 }
0x28e2   :  { %3000 = vtanh.f32 %v2070_v59 }
0x28ec   :  { %v3001_v60 = vpop.eup %3000 }
0x28ed   :  { %2073 = vrot.lane.b32.xlu0 %v3001_v60, %s3175_s27 }
0x295f   :  { %v2074_v61 = vpop.permute.xlu0 %2073 }
0x2960   :  { %v2076_v62 = vmul.f32 %v2999_v55, %v2074_v61 }
0x2962   :  { %v2084_v63 = vrot.slane %v2076_v62, %v3347_v9 }
0x2964   :  { %2085 = vrot.lane.b32.xlu1 %v2084_v63, %s3179_s4 }
0x29d6   :  { %v2086_v0 = vpop.permute.xlu1 %2085 }
0x29d7   :  { %2725 = vmatmul.mubr.msk.f32.vlgmr.msra.gmra.mrb[16].mxu1 %vm202_vm1, %v2086_v0 }
0x29d8   :  { %2751 = vmatprep.mubr.msk.bf16.mxu1 %vm3187_vm0, %v3186_v1  ;;  %2736 = vmatpush3.bf16.msra.mxu1 %v2874_v21 }
0x29d9   :  { %2737 = vmatprep.subr.bf16.mxu1 %v3186_v1 }
0x29dc   :  { %2738 = vmatpush3.bf16.msra.mxu1 %v2875_v23 }
0x29dd   :  { %2739 = vmatprep.subr.bf16.mxu1 %v3186_v1 }
0x29e0   :  { %2740 = vmatpush3.bf16.msra.mxu1 %v2876_v24 }
0x29e1   :  { %2741 = vmatprep.subr.bf16.mxu1 %v3186_v1 }
0x29e4   :  { %2742 = vmatpush3.bf16.msra.mxu1 %v2877_v26 }
0x29e5   :  { %2743 = vmatprep.subr.bf16.mxu1 %v3186_v1 }
0x29e8   :  { %2744 = vmatpush3.bf16.msra.mxu1 %v2878_v29 }
0x29e9   :  { %2745 = vmatprep.subr.bf16.mxu1 %v3186_v1 }
0x29ec   :  { %2746 = vmatpush3.bf16.msra.mxu1 %v2879_v33 }
0x29ed   :  { %2747 = vmatprep.subr.bf16.mxu1 %v3186_v1 }
0x29f0   :  { %2748 = vmatpush3.bf16.msra.mxu1 %v2880_v31 }
0x29f1   :  { %2749 = vmatprep.subr.bf16.mxu1 %v3186_v1 }
0x29f4   :  { %2750 = vmatpush3.bf16.msra.mxu1 %v2881_v32 }
0x2aaa   :  { %v2155_v3 = vpop.f32.mrb[16].mxu1 }
0x2aab   :  { %v2159_v5 = vadd.f32 %v2155_v3, %v1331_v2  ;;  %v2726_v6 = vpop.f32.mrb[17].mxu1 }
0x2aad   :  { %3002 = vtanh.f32 %v2159_v5  ;;  %v2423_v8 = vmul.f32 -1.442695, %v2159_v5 }
0x2aaf   :  { %3004 = vpow2.f32 %v2423_v8 }
0x2ab7   :  { %v3003_v7 = vpop.eup %3002 }
0x2ab8   :  { %2169 = vrot.lane.b32.xlu0 %v3003_v7, %s3175_s27 }
0x2ab9   :  { %v3005_v10 = vpop.eup %3004 }
0x2aba   :  { %v2163_v9 = vadd.f32 1.0, %v3005_v10 }
0x2abc   :  { %3006 = vrcp.f32 %v2163_v9 }
0x2ac6   :  { %v3007_v11 = vpop.eup %3006 }
0x2ac7   :  { %v2167_v14 = vmul.f32 %v3007_v11, %v2070_v59 }
0x2b2a   :  { %v2170_v12 = vpop.permute.xlu0 %2169 }
0x2b2b   :  { %v2172_v13 = vmul.f32 %v3007_v11, %v2170_v12 }
0x2b2d   :  { %2174 = vrot.lane.b32.xlu1 %v2172_v13, %s3179_s4 }
0x2b9f   :  { %v2175_v15 = vpop.permute.xlu1 %2174 }
0x2ba0   :  { %v2177_v17 = vadd.f32 %v2175_v15, %v2167_v14 }
0x2ba2   :  { %3008 = vtanh.f32 %v2177_v17 }
0x2bac   :  { %v3009_v20 = vpop.eup %3008 }
0x2bad   :  { %2180 = vrot.lane.b32.xlu0 %v3009_v20, %s3175_s27 }
0x2c1f   :  { %v2181_v28 = vpop.permute.xlu0 %2180 }
0x2c20   :  { %v2183_v25 = vmul.f32 %v3007_v11, %v2181_v28 }
0x2c22   :  { %v2184_v27 = vpack.c.bf16 %v2183_v25, %v2183_v25 }
0x2c24   :  { %2197 = vrot.lane.b32.xlu1 %v2184_v27, %s3179_s4 }
0x2c96   :  { %v2198_v30 = vpop.permute.xlu1 %2197 }
0x2c97   :  { %2732 = vmatmul.mubr.msk.bf16.vlgmr.msra.gmra.mrb[24].mxu0 %vm202_vm1, %v2198_v30 }
0x2d6a   :  { %v2248_v16 = vpop.f32.mrb[24].mxu0 }
0x2d6b   :  { %v2249_v35 = vadd.f32 %v2424_v34, %v2248_v16  ;;  %v2733_v36 = vpop.f32.mrb[25].mxu0 }
0x2d6c   :  { %v2251_v37 = vpop.f32.mrb[26].mxu0 }
0x2d6d   :  { %v2254_v4 = vmax.f32 %v2249_v35, 0.0  ;;  %v2734_v22 = vpop.f32.mrb[27].mxu0 }
0x2d6f   :  { %v2255_v38 = vpack.c.bf16 %v2254_v4, %v2254_v4 }
0x2d71   :  { %2752 = vmatmul.mubr.bf16.vlgmr.msra.gmra.mrb[20].mxu1 %v2255_v38 }
0x2e44   :  { %v2361_v1 = vpop.f32.mrb[20].mxu1 }
0x2e45   :  { %v2362_v41 = vadd.f32 %v2428_v39, %v2361_v1  ;;  %v2753_v42 = vpop.f32.mrb[21].mxu1 }
0x2e46   :  { %v2364_v43 = vpop.f32.mrb[22].mxu1 }
0x2e47   :  { %2367 = vst [vmem:[#allocation14] sm:$0x3] %v2362_v41  ;;  %v2754_v44 = vpop.f32.mrb[23].mxu1 }
0x2e48   :  { %3153 = shalt.err (!%p3150_p10)
}
0x2e49   :  { %s3154_s10 = scalar_lea.hbm %s3652_s11, 32 }
0x2e4a   :  { %p3155_p11 = scmp.ne.s32.totalorder %s3652_s11, %s3154_s10  ;;  %p3158_p12 = scmp.lt.u32.totalorder %s3154_s10, %s3652_s11 }
0x2e4c   :  { %p3160_p13 = pnand %p3158_p12, %p3155_p11 }
0x2e4e   :  { %3163 = shalt.err (!%p3160_p13)
}
0x2e4f   :  { %2377 = dma.vmem_to_hbm [thread:$0]  %s2375_s24, 32, %s3652_s11, [#allocation5]  }
0x2e50   :  { %3172 = dma.done.wait [#allocation5], 32  }
0x2e51   :  { %3173 = vsyncadd [#allocation5], 4294967264 }
0x2e52   :  { %2381 = vsyncpa [#allocation4], 1 }
0x2e53   :  { %2382 = vsyncpa [#allocation7], 1 }
0x2e54   :  { %2383 = vsyncpa [#allocation10], 1 }
0x2e55   :  { %2384 = vsyncpa [#allocation13], 1 }
0x2e56   :  { %2385 = vsyncpa [#allocation5], 1 }

</bundles_post_ra>
